<compile_context>
chip_gen: v7x
topology: tpu7x:2x2x1
jax: 0.10.0
libtpu: 0.0.40
codegen_flags: <defaults>
</compile_context>

<pallas_src>
import functools
import math

import jax
import jax.numpy as jnp
from jax import lax
from jax.experimental import pallas as pl
from jax.experimental.pallas import tpu as pltpu

LN_EPS = 1e-12
_ROW_TILE_CAP = 512                  # v5e/v6e have headroom; OK on v7x since I is K-tiled
_COL_TILE_CAP = 1024                 # K-tile of the FFN intermediate dim
_VMEM_LIMIT = 48 * 1024 * 1024       # > v5e 16 MiB / v6e-v7x 32 MiB scoped defaults


# ------------------------------ tiling helpers ------------------------------

def _row_tile(m, cap=_ROW_TILE_CAP):
    return m if m <= cap else cap


def _col_tile(n, cap=_COL_TILE_CAP):
    if n <= cap:
        return n
    for t in (1024, 512, 256, 128):
        if n % t == 0:
            return t
    return n  # TODO(synk): ragged intermediate dims would need padding/masking.


def _pad_rows(arrays, tile):
    """Pad the leading (row) dim of each array up to a multiple of `tile` (static)."""
    m = arrays[0].shape[0]
    pad = (-m) % tile
    if pad == 0:
        return list(arrays), m
    return [jnp.pad(a, ((0, pad), (0, 0))) for a in arrays], m


def _head_grouping(num_heads, head_dim):
    """Heads per grid step so the attention output store is >=128 lanes wide."""
    hpg = max(1, min(num_heads, 128 // max(head_dim, 1)))
    while num_heads % hpg:
        hpg -= 1
    return max(1, hpg)


def _mosaic(*sem):
    return pltpu.CompilerParams(dimension_semantics=sem, vmem_limit_bytes=_VMEM_LIMIT)


# ------------------------------ math helpers --------------------------------

def _layernorm_f32(y, g, b):
    mean = jnp.mean(y, axis=-1, keepdims=True)
    var = jnp.mean(jnp.square(y - mean), axis=-1, keepdims=True)
    return (y - mean) * lax.rsqrt(var + LN_EPS) * g + b


def _gelu_f32(y):
    # TODO(synk): HF BERT default is exact erf-GELU; tanh approximation used here.
    c = math.sqrt(2.0 / math.pi)
    return 0.5 * y * (1.0 + jnp.tanh(c * (y + 0.044715 * y * y * y)))


# ----------------------------- Pallas kernels -------------------------------

def _ln_kernel(x_ref, pk_ref, o_ref):
    """No-residual LayerNorm (embeddings). pk = [gamma; beta], shape (2, H)."""
    pk = pk_ref[...]
    y = x_ref[...].astype(jnp.float32)
    o_ref[...] = _layernorm_f32(y, pk[0:1], pk[1:2]).astype(o_ref.dtype)


def layernorm(x, packed_gb):
    M, H = x.shape
    tm = _row_tile(M)
    (x,), m0 = _pad_rows([x], tm)
    mp = x.shape[0]
    out = pl.pallas_call(
        _ln_kernel,
        out_shape=jax.ShapeDtypeStruct((mp, H), jnp.bfloat16),
        grid=(mp // tm,),
        in_specs=[
            pl.BlockSpec((tm, H), lambda i: (i, 0)),
            pl.BlockSpec((2, H), lambda i: (0, 0)),
        ],
        out_specs=pl.BlockSpec((tm, H), lambda i: (i, 0)),
        compiler_params=_mosaic("parallel"),
    )(x, packed_gb)
    return out[:m0] if mp != m0 else out


def _attn_kernel(x_ref, w_ref, b_ref, m_ref, o_ref, *, heads_per_group, head_dim, scale):
    """Fused QKV projection + softmax attention for one (batch, head-group) step.

    x_ref: (1, S, H) bf16, w_ref: (1, H, 3*Gd) bf16, b_ref: (1, 3*Gd) f32,
    m_ref: (1, 1, S) f32 additive mask, o_ref: (1, S, Gd) bf16, Gd = hpg*Dh (>=128).
    """
    x = x_ref[0]                                   # (S, H) bf16
    w = w_ref[0]                                   # (H, 3*Gd) bf16
    S = x.shape[0]
    Gd = heads_per_group * head_dim

    qkv = jnp.dot(x, w, preferred_element_type=jnp.float32) + b_ref[...]   # (S, 3Gd) f32
    qkv = qkv.astype(jnp.bfloat16)

    # Hoisted mask broadcast (JAX does not CSE broadcast_in_dim inside the loop).
    mask = jnp.broadcast_to(m_ref[0], (S, S))      # (S, S) f32

    # Short per-head loop (heads_per_group is small, typically 2) — live ranges are
    # bounded by the grid axis over head groups, not a 12-way unroll.
    # TODO(synk): could batch heads in one dot_general with a head batch dim to keep
    # the MXU pipeline fed across heads (v6e micro-opt).
    ctx_parts = []
    for h in range(heads_per_group):
        q = qkv[:, h * head_dim:(h + 1) * head_dim]                 # (S, Dh)
        k = qkv[:, Gd + h * head_dim:Gd + (h + 1) * head_dim]       # (S, Dh)
        v = qkv[:, 2 * Gd + h * head_dim:2 * Gd + (h + 1) * head_dim]
        s = lax.dot_general(q, k, (((1,), (1,)), ((), ())),
                            preferred_element_type=jnp.float32) * scale + mask   # (S, S)
        s = s - jnp.max(s, axis=-1, keepdims=True)
        p = jnp.exp(s)
        p = p * pl.reciprocal(jnp.sum(p, axis=-1, keepdims=True), approx=True)
        ctx_parts.append(jnp.dot(p.astype(v.dtype), v,
                                 preferred_element_type=jnp.float32))           # (S, Dh)

    ctx = jnp.concatenate(ctx_parts, axis=-1)      # (S, Gd): one lane-dense store
    o_ref[0] = ctx.astype(o_ref.dtype)


def fused_qkv_attention(x, w_packed, b_packed, mask, num_heads):
    """x: (B, S, H) bf16, w_packed: (G, H, 3*Gd) bf16, b_packed: (G, 3*Gd) f32,
    mask: (B, 1, S) f32 additive  ->  context (B, S, H) bf16."""
    B, S, H = x.shape
    G, _, gd3 = w_packed.shape
    Gd = gd3 // 3
    Dh = H // num_heads
    hpg = Gd // Dh
    kernel = functools.partial(_attn_kernel, heads_per_group=hpg, head_dim=Dh,
                               scale=1.0 / math.sqrt(Dh))
    return pl.pallas_call(
        kernel,
        out_shape=jax.ShapeDtypeStruct((B, S, H), jnp.bfloat16),
        grid=(B, G),
        in_specs=[
            pl.BlockSpec((1, S, H), lambda b, g: (b, 0, 0)),
            pl.BlockSpec((1, H, gd3), lambda b, g: (g, 0, 0)),
            pl.BlockSpec((1, gd3), lambda b, g: (g, 0)),
            pl.BlockSpec((1, 1, S), lambda b, g: (b, 0, 0)),
        ],
        out_specs=pl.BlockSpec((1, S, Gd), lambda b, g: (b, 0, g)),
        compiler_params=_mosaic("parallel", "parallel"),
    )(x, w_packed, b_packed, mask)


def _dense_add_ln_kernel(x_ref, r_ref, w_ref, pk_ref, o_ref):
    """LayerNorm(residual + x @ w + bias). pk = [bias; gamma; beta], shape (3, N)."""
    pk = pk_ref[...]
    y = jnp.dot(x_ref[...], w_ref[...], preferred_element_type=jnp.float32) + pk[0:1]
    y = y + r_ref[...].astype(jnp.float32)
    o_ref[...] = _layernorm_f32(y, pk[1:2], pk[2:3]).astype(o_ref.dtype)


def dense_add_ln(x, residual, w, packed):
    M, H = x.shape
    N = w.shape[1]
    tm = _row_tile(M)
    (x, residual), m0 = _pad_rows([x, residual], tm)
    mp = x.shape[0]
    out = pl.pallas_call(
        _dense_add_ln_kernel,
        out_shape=jax.ShapeDtypeStruct((mp, N), jnp.bfloat16),
        grid=(mp // tm,),
        in_specs=[
            pl.BlockSpec((tm, H), lambda i: (i, 0)),
            pl.BlockSpec((tm, N), lambda i: (i, 0)),
            pl.BlockSpec((H, N), lambda i: (0, 0)),
            pl.BlockSpec((3, N), lambda i: (0, 0)),
        ],
        out_specs=pl.BlockSpec((tm, N), lambda i: (i, 0)),
        compiler_params=_mosaic("parallel"),
    )(x, residual, w, packed)
    return out[:m0] if mp != m0 else out


def _ffn_kernel(x_ref, wi_ref, bi_ref, wo_ref, pk_ref, o_ref, acc_ref):
    """K-tiled FFN: LayerNorm(x + GELU(x @ wi + bi) @ wo + bo).
    Grid axis 1 tiles the intermediate dim; acc_ref is the f32 VMEM accumulator.
    pk = [bo; gamma; beta], shape (3, H)."""
    k = pl.program_id(1)

    @pl.when(k == 0)
    def _():
        acc_ref[...] = jnp.zeros_like(acc_ref)

    x = x_ref[...]                                                     # (tm, H) bf16
    h = jnp.dot(x, wi_ref[...], preferred_element_type=jnp.float32) + bi_ref[...]
    h = _gelu_f32(h)
    acc_ref[...] += jnp.dot(h.astype(jnp.bfloat16), wo_ref[...],
                            preferred_element_type=jnp.float32)

    @pl.when(k == pl.num_programs(1) - 1)
    def _():
        pk = pk_ref[...]
        y = acc_ref[...] + pk[0:1] + x.astype(jnp.float32)
        o_ref[...] = _layernorm_f32(y, pk[1:2], pk[2:3]).astype(o_ref.dtype)


def ffn_block(x, wi, bi, wo, packed):
    M, H = x.shape
    I = wi.shape[1]
    tm = _row_tile(M)
    ti = _col_tile(I)
    (x,), m0 = _pad_rows([x], tm)
    mp = x.shape[0]
    out = pl.pallas_call(
        _ffn_kernel,
        out_shape=jax.ShapeDtypeStruct((mp, H), jnp.bfloat16),
        grid=(mp // tm, I // ti),
        in_specs=[
            pl.BlockSpec((tm, H), lambda i, k: (i, 0)),
            pl.BlockSpec((H, ti), lambda i, k: (0, k)),
            pl.BlockSpec((1, ti), lambda i, k: (0, k)),
            pl.BlockSpec((ti, H), lambda i, k: (k, 0)),
            pl.BlockSpec((3, H), lambda i, k: (0, 0)),
        ],
        out_specs=pl.BlockSpec((tm, H), lambda i, k: (i, 0)),
        scratch_shapes=[pltpu.VMEM((tm, H), jnp.float32)],
        compiler_params=_mosaic("parallel", "arbitrary"),
    )(x, wi, bi, wo, packed)
    return out[:m0] if mp != m0 else out


# ------------------------------- BERT model ---------------------------------

class BertConfig:
    vocab_size = 100
    max_position = 16
    type_vocab_size = 2
    hidden_size = 128          # lane-dense (multiple of 128)
    num_heads = 2
    intermediate_size = 512
    num_layers = 2


def pack_qkv(wq, wk, wv, bq, bk, bv, num_heads, hpg):
    """Pack per-head-group QKV weight slices: (G, H, 3*Gd) and (G, 3*Gd)."""
    H = wq.shape[0]
    Dh = H // num_heads
    G = num_heads // hpg
    Gd = hpg * Dh

    def split_w(w):                         # (H, H) -> (G, H, Gd)
        return w.reshape(H, G, Gd).transpose(1, 0, 2)

    def split_b(b):                         # (H,) -> (G, Gd)
        return b.reshape(G, Gd)

    w_packed = jnp.concatenate([split_w(wq), split_w(wk), split_w(wv)], axis=-1)
    b_packed = jnp.concatenate([split_b(bq), split_b(bk), split_b(bv)], axis=-1)
    return w_packed, b_packed


def init_params(key, cfg):
    std = 0.02
    H, I = cfg.hidden_size, cfg.intermediate_size
    Dh = H // cfg.num_heads
    hpg = _head_grouping(cfg.num_heads, Dh)

    def nrm(k, shape, dtype=jnp.float32):
        return (std * jax.random.normal(k, shape, jnp.float32)).astype(dtype)

    keys = iter(jax.random.split(key, 4 + cfg.num_layers * 6))
    params = {
        "word_emb": nrm(next(keys), (cfg.vocab_size, H)),
        "pos_emb": nrm(next(keys), (cfg.max_position, H)),
        "type_emb": nrm(next(keys), (cfg.type_vocab_size, H)),
        "emb_ln": jnp.stack([jnp.ones((H,)), jnp.zeros((H,))]).astype(jnp.float32),
        "pool_w": nrm(next(keys), (H, H)),
        "pool_b": jnp.zeros((H,), jnp.float32),
        "layers": [],
    }
    for _ in range(cfg.num_layers):
        wq = nrm(next(keys), (H, H))
        wk = nrm(next(keys), (H, H))
        wv = nrm(next(keys), (H, H))
        zb = jnp.zeros((H,), jnp.float32)
        qkv_w, qkv_b = pack_qkv(wq, wk, wv, zb, zb, zb, cfg.num_heads, hpg)
        params["layers"].append({
            "qkv_w": qkv_w.astype(jnp.bfloat16),          # (G, H, 3*Gd)
            "qkv_b": qkv_b.astype(jnp.float32),           # (G, 3*Gd)
            "ao_w": nrm(next(keys), (H, H), jnp.bfloat16),
            # packed [bias; gamma; beta] for attn-output dense + LN
            "attn_pk": jnp.stack([jnp.zeros((H,)), jnp.ones((H,)),
                                  jnp.zeros((H,))]).astype(jnp.float32),
            "i_w": nrm(next(keys), (H, I), jnp.bfloat16),
            "i_b": jnp.zeros((1, I), jnp.float32),
            "o_w": nrm(next(keys), (I, H), jnp.bfloat16),
            # packed [bias; gamma; beta] for FFN output dense + LN
            "out_pk": jnp.stack([jnp.zeros((H,)), jnp.ones((H,)),
                                 jnp.zeros((H,))]).astype(jnp.float32),
        })
    return params


def bert_encoder_forward(params, input_ids, attention_mask, token_type_ids, cfg):
    """Equivalent to BertEncoder.forward(**encoded_input) -> pooler_output."""
    B, S = input_ids.shape
    H = cfg.hidden_size
    M = B * S

    # --- embeddings (gather is glue; LayerNorm in Pallas) ---
    emb = (params["word_emb"][input_ids]
           + params["pos_emb"][jnp.arange(S)][None, :, :]
           + params["type_emb"][token_type_ids])                        # (B, S, H) f32
    x = layernorm(emb.reshape(M, H), params["emb_ln"])                  # (M, H) bf16

    # --- additive attention mask per batch element: (B, 1, S) ---
    ext_mask = ((1.0 - attention_mask.astype(jnp.float32)) * -10000.0).reshape(B, 1, S)

    for layer in params["layers"]:
        # self-attention: QKV projection fused into the attention kernel
        # (grid = batch x head-group, lane-dense output stores).
        ctx = fused_qkv_attention(x.reshape(B, S, H), layer["qkv_w"], layer["qkv_b"],
                                  ext_mask, cfg.num_heads)              # (B, S, H) bf16
        # fused (output dense + residual + LayerNorm)
        x = dense_add_ln(ctx.reshape(M, H), x, layer["ao_w"], layer["attn_pk"])
        # fused FFN: (dense + GELU + dense + residual + LayerNorm), I K-tiled
        x = ffn_block(x, layer["i_w"], layer["i_b"], layer["o_w"], layer["out_pk"])

    # --- pooler: dense + tanh on the [CLS] hidden state (plain JAX: tiny matmul) ---
    cls = x.reshape(B, S, H)[:, 0, :].astype(jnp.float32)               # (B, H)
    pooler_output = jnp.tanh(cls @ params["pool_w"] + params["pool_b"])
    return pooler_output                                                # (B, H) f32


# --------------------------------- main --------------------------------------

if __name__ == "__main__":
    cfg = BertConfig()
    B, S = 2, 8

    key = jax.random.PRNGKey(0)
    k_params, k_ids = jax.random.split(key)

    params = init_params(k_params, cfg)

    input_ids = jax.random.randint(k_ids, (B, S), 0, cfg.vocab_size, dtype=jnp.int32)
    attention_mask = jnp.ones((B, S), dtype=jnp.int32)
    token_type_ids = jnp.zeros((B, S), dtype=jnp.int32)

    forward = jax.jit(functools.partial(bert_encoder_forward, cfg=cfg))
    pooled = forward(params, input_ids, attention_mask, token_type_ids)
    pooled = jax.block_until_ready(pooled)

    assert pooled.shape == (B, cfg.hidden_size)
    assert pooled.dtype == jnp.float32
    print("KERNEL_OK")
</pallas_src>

<mosaic_0001>
module attributes {stable_mosaic.version = 11 : i64} {
  func.func @_attn_kernel(%arg0: i32, %arg1: i32, %arg2: memref<1x8x128xbf16, #tpu.memory_space<vmem>>, %arg3: memref<1x128x384xbf16, #tpu.memory_space<vmem>>, %arg4: memref<1x384xf32, #tpu.memory_space<vmem>>, %arg5: memref<1x1x8xf32, #tpu.memory_space<vmem>>, %arg6: memref<1x8x128xbf16, #tpu.memory_space<vmem>>) attributes {dimension_semantics = [#tpu.dimension_semantics<parallel>, #tpu.dimension_semantics<parallel>], iteration_bounds = array<i64: 2, 1>, scalar_prefetch = 0 : i64, scratch_operands = 0 : i64, tpu.core_type = #tpu.core_type<tc>, window_params = [{transform_indices = @transform_0, window_bounds = array<i64: 1, 8, 128>}, {transform_indices = @transform_1, window_bounds = array<i64: 1, 128, 384>}, {transform_indices = @transform_2, window_bounds = array<i64: 1, 384>}, {transform_indices = @transform_3, window_bounds = array<i64: 1, 1, 8>}, {transform_indices = @transform_4, window_bounds = array<i64: 1, 8, 128>}]} {
    %c0 = arith.constant 0 : index
    %c0_0 = arith.constant 0 : index
    %c0_1 = arith.constant 0 : index
    %0 = vector.load %arg2[%c0, %c0_0, %c0_1] : memref<1x8x128xbf16, #tpu.memory_space<vmem>>, vector<1x8x128xbf16>
    %1 = vector.shape_cast %0 : vector<1x8x128xbf16> to vector<8x128xbf16>
    %c0_2 = arith.constant 0 : index
    %c0_3 = arith.constant 0 : index
    %c0_4 = arith.constant 0 : index
    %2 = vector.load %arg3[%c0_2, %c0_3, %c0_4] : memref<1x128x384xbf16, #tpu.memory_space<vmem>>, vector<1x128x384xbf16>
    %3 = vector.shape_cast %2 : vector<1x128x384xbf16> to vector<128x384xbf16>
    %cst = arith.constant dense<0.000000e+00> : vector<8x384xf32>
    %4 = tpu.matmul %1, %3, %cst {dimension_numbers = #tpu.dot_dimension_numbers<[1], [0], [0], [1], [0, 0, 1, 1], [], []>} : vector<8x128xbf16>, vector<128x384xbf16>, vector<8x384xf32> -> vector<8x384xf32>
    %c0_5 = arith.constant 0 : index
    %c0_6 = arith.constant 0 : index
    %5 = vector.load %arg4[%c0_5, %c0_6] : memref<1x384xf32, #tpu.memory_space<vmem>>, vector<1x384xf32>
    %6 = vector.broadcast %5 : vector<1x384xf32> to vector<8x384xf32>
    %7 = arith.addf %4, %6 : vector<8x384xf32>
    %8 = arith.truncf %7 : vector<8x384xf32> to vector<8x384xbf16>
    %c0_7 = arith.constant 0 : index
    %c0_8 = arith.constant 0 : index
    %c0_9 = arith.constant 0 : index
    %9 = vector.load %arg5[%c0_7, %c0_8, %c0_9] : memref<1x1x8xf32, #tpu.memory_space<vmem>>, vector<1x1x8xf32>
    %10 = vector.shape_cast %9 : vector<1x1x8xf32> to vector<1x8xf32>
    %11 = vector.shape_cast %10 : vector<1x8xf32> to vector<1x8xf32>
    %12 = vector.broadcast %11 : vector<1x8xf32> to vector<8x8xf32>
    %13 = vector.extract_strided_slice %8 {offsets = [0, 0], sizes = [8, 64], strides = [1, 1]} : vector<8x384xbf16> to vector<8x64xbf16>
    %14 = vector.extract_strided_slice %8 {offsets = [0, 128], sizes = [8, 64], strides = [1, 1]} : vector<8x384xbf16> to vector<8x64xbf16>
    %15 = vector.extract_strided_slice %8 {offsets = [0, 256], sizes = [8, 64], strides = [1, 1]} : vector<8x384xbf16> to vector<8x64xbf16>
    %cst_10 = arith.constant dense<0.000000e+00> : vector<8x8xf32>
    %16 = tpu.matmul %13, %14, %cst_10 {dimension_numbers = #tpu.dot_dimension_numbers<[1], [1], [0], [0], [0, 0, 1, 0], [], []>} : vector<8x64xbf16>, vector<8x64xbf16>, vector<8x8xf32> -> vector<8x8xf32>
    %cst_11 = arith.constant 1.250000e-01 : f32
    %17 = vector.broadcast %cst_11 : f32 to vector<8x8xf32>
    %18 = arith.mulf %16, %17 : vector<8x8xf32>
    %19 = arith.addf %18, %12 : vector<8x8xf32>
    %cst_12 = arith.constant dense<0xFF800000> : vector<8xf32>
    %20 = vector.multi_reduction <maximumf>, %19, %cst_12 [1] : vector<8x8xf32> to vector<8xf32>
    %21 = vector.shape_cast %20 : vector<8xf32> to vector<8x1xf32>
    %22 = vector.broadcast %21 : vector<8x1xf32> to vector<8x8xf32>
    %23 = arith.subf %19, %22 : vector<8x8xf32>
    %24 = math.exp %23 : vector<8x8xf32>
    %cst_13 = arith.constant dense<0.000000e+00> : vector<8xf32>
    %25 = vector.multi_reduction <add>, %24, %cst_13 [1] : vector<8x8xf32> to vector<8xf32>
    %26 = vector.shape_cast %25 : vector<8xf32> to vector<8x1xf32>
    %27 = tpu.reciprocal %26 {approx = true} : vector<8x1xf32> -> vector<8x1xf32>
    %28 = vector.broadcast %27 : vector<8x1xf32> to vector<8x8xf32>
    %29 = arith.mulf %24, %28 : vector<8x8xf32>
    %30 = arith.truncf %29 : vector<8x8xf32> to vector<8x8xbf16>
    %cst_14 = arith.constant dense<0.000000e+00> : vector<8x64xf32>
    %31 = tpu.matmul %30, %15, %cst_14 {dimension_numbers = #tpu.dot_dimension_numbers<[1], [0], [0], [1], [0, 0, 1, 1], [], []>} : vector<8x8xbf16>, vector<8x64xbf16>, vector<8x64xf32> -> vector<8x64xf32>
    %32 = vector.extract_strided_slice %8 {offsets = [0, 64], sizes = [8, 64], strides = [1, 1]} : vector<8x384xbf16> to vector<8x64xbf16>
    %33 = vector.extract_strided_slice %8 {offsets = [0, 192], sizes = [8, 64], strides = [1, 1]} : vector<8x384xbf16> to vector<8x64xbf16>
    %34 = vector.extract_strided_slice %8 {offsets = [0, 320], sizes = [8, 64], strides = [1, 1]} : vector<8x384xbf16> to vector<8x64xbf16>
    %cst_15 = arith.constant dense<0.000000e+00> : vector<8x8xf32>
    %35 = tpu.matmul %32, %33, %cst_15 {dimension_numbers = #tpu.dot_dimension_numbers<[1], [1], [0], [0], [0, 0, 1, 0], [], []>} : vector<8x64xbf16>, vector<8x64xbf16>, vector<8x8xf32> -> vector<8x8xf32>
    %cst_16 = arith.constant 1.250000e-01 : f32
    %36 = vector.broadcast %cst_16 : f32 to vector<8x8xf32>
    %37 = arith.mulf %35, %36 : vector<8x8xf32>
    %38 = arith.addf %37, %12 : vector<8x8xf32>
    %cst_17 = arith.constant dense<0xFF800000> : vector<8xf32>
    %39 = vector.multi_reduction <maximumf>, %38, %cst_17 [1] : vector<8x8xf32> to vector<8xf32>
    %40 = vector.shape_cast %39 : vector<8xf32> to vector<8x1xf32>
    %41 = vector.broadcast %40 : vector<8x1xf32> to vector<8x8xf32>
    %42 = arith.subf %38, %41 : vector<8x8xf32>
    %43 = math.exp %42 : vector<8x8xf32>
    %cst_18 = arith.constant dense<0.000000e+00> : vector<8xf32>
    %44 = vector.multi_reduction <add>, %43, %cst_18 [1] : vector<8x8xf32> to vector<8xf32>
    %45 = vector.shape_cast %44 : vector<8xf32> to vector<8x1xf32>
    %46 = tpu.reciprocal %45 {approx = true} : vector<8x1xf32> -> vector<8x1xf32>
    %47 = vector.broadcast %46 : vector<8x1xf32> to vector<8x8xf32>
    %48 = arith.mulf %43, %47 : vector<8x8xf32>
    %49 = arith.truncf %48 : vector<8x8xf32> to vector<8x8xbf16>
    %cst_19 = arith.constant dense<0.000000e+00> : vector<8x64xf32>
    %50 = tpu.matmul %49, %34, %cst_19 {dimension_numbers = #tpu.dot_dimension_numbers<[1], [0], [0], [1], [0, 0, 1, 1], [], []>} : vector<8x8xbf16>, vector<8x64xbf16>, vector<8x64xf32> -> vector<8x64xf32>
    %51 = tpu.concatenate %31, %50 in 1 : vector<8x64xf32>, vector<8x64xf32> -> vector<8x128xf32>
    %52 = arith.truncf %51 : vector<8x128xf32> to vector<8x128xbf16>
    %c0_20 = arith.constant 0 : index
    %c0_21 = arith.constant 0 : index
    %c0_22 = arith.constant 0 : index
    %53 = vector.load %arg6[%c0_20, %c0_21, %c0_22] : memref<1x8x128xbf16, #tpu.memory_space<vmem>>, vector<1x8x128xbf16>
    %54 = vector.shape_cast %53 : vector<1x8x128xbf16> to vector<8x128xbf16>
    %55 = vector.shape_cast %52 : vector<8x128xbf16> to vector<1x8x128xbf16>
    tpu.vector_store %arg6[%c0_20, %c0_21, %c0_22], %55 {strides = array<i32>} : memref<1x8x128xbf16, #tpu.memory_space<vmem>>, vector<1x8x128xbf16>,
    return
  }
  func.func @transform_0(%arg0: i32, %arg1: i32) -> (i32, i32, i32) {
    %c0_i32 = arith.constant 0 : i32
    %c0_i32_0 = arith.constant 0 : i32
    %c0_i32_1 = arith.constant 0 : i32
    return %arg0, %c0_i32, %c0_i32_0 : i32, i32, i32
  }
  func.func @transform_1(%arg0: i32, %arg1: i32) -> (i32, i32, i32) {
    %c0_i32 = arith.constant 0 : i32
    %c0_i32_0 = arith.constant 0 : i32
    %c0_i32_1 = arith.constant 0 : i32
    return %arg1, %c0_i32, %c0_i32_0 : i32, i32, i32
  }
  func.func @transform_2(%arg0: i32, %arg1: i32) -> (i32, i32) {
    %c0_i32 = arith.constant 0 : i32
    %c0_i32_0 = arith.constant 0 : i32
    return %arg1, %c0_i32 : i32, i32
  }
  func.func @transform_3(%arg0: i32, %arg1: i32) -> (i32, i32, i32) {
    %c0_i32 = arith.constant 0 : i32
    %c0_i32_0 = arith.constant 0 : i32
    %c0_i32_1 = arith.constant 0 : i32
    return %arg0, %c0_i32, %c0_i32_0 : i32, i32, i32
  }
  func.func @transform_4(%arg0: i32, %arg1: i32) -> (i32, i32, i32) {
    %c0_i32 = arith.constant 0 : i32
    %c0_i32_0 = arith.constant 0 : i32
    return %arg0, %c0_i32, %arg1 : i32, i32, i32
  }
}

module attributes {stable_mosaic.version = 11 : i64} {
  func.func @_dense_add_ln_kernel(%arg0: i32, %arg1: memref<16x128xbf16, #tpu.memory_space<vmem>>, %arg2: memref<16x128xbf16, #tpu.memory_space<vmem>>, %arg3: memref<128x128xbf16, #tpu.memory_space<vmem>>, %arg4: memref<3x128xf32, #tpu.memory_space<vmem>>, %arg5: memref<16x128xbf16, #tpu.memory_space<vmem>>) attributes {dimension_semantics = [#tpu.dimension_semantics<parallel>], iteration_bounds = array<i64: 1>, scalar_prefetch = 0 : i64, scratch_operands = 0 : i64, tpu.core_type = #tpu.core_type<tc>, window_params = [{transform_indices = @transform_0, window_bounds = array<i64: 16, 128>}, {transform_indices = @transform_1, window_bounds = array<i64: 16, 128>}, {pipeline_mode = #tpu.pipeline_mode<synchronous>, transform_indices = @transform_2, window_bounds = array<i64: 128, 128>}, {pipeline_mode = #tpu.pipeline_mode<synchronous>, transform_indices = @transform_3, window_bounds = array<i64: 3, 128>}, {transform_indices = @transform_4, window_bounds = array<i64: 16, 128>}]} {
    %c0 = arith.constant 0 : index
    %c0_0 = arith.constant 0 : index
    %0 = vector.load %arg4[%c0, %c0_0] : memref<3x128xf32, #tpu.memory_space<vmem>>, vector<3x128xf32>
    %c0_1 = arith.constant 0 : index
    %c0_2 = arith.constant 0 : index
    %1 = vector.load %arg1[%c0_1, %c0_2] : memref<16x128xbf16, #tpu.memory_space<vmem>>, vector<16x128xbf16>
    %c0_3 = arith.constant 0 : index
    %c0_4 = arith.constant 0 : index
    %2 = vector.load %arg3[%c0_3, %c0_4] : memref<128x128xbf16, #tpu.memory_space<vmem>>, vector<128x128xbf16>
    %cst = arith.constant dense<0.000000e+00> : vector<16x128xf32>
    %3 = tpu.matmul %1, %2, %cst {dimension_numbers = #tpu.dot_dimension_numbers<[1], [0], [0], [1], [0, 0, 1, 1], [], []>} : vector<16x128xbf16>, vector<128x128xbf16>, vector<16x128xf32> -> vector<16x128xf32>
    %4 = vector.extract_strided_slice %0 {offsets = [0, 0], sizes = [1, 128], strides = [1, 1]} : vector<3x128xf32> to vector<1x128xf32>
    %5 = vector.broadcast %4 : vector<1x128xf32> to vector<16x128xf32>
    %6 = arith.addf %3, %5 : vector<16x128xf32>
    %c0_5 = arith.constant 0 : index
    %c0_6 = arith.constant 0 : index
    %7 = vector.load %arg2[%c0_5, %c0_6] : memref<16x128xbf16, #tpu.memory_space<vmem>>, vector<16x128xbf16>
    %8 = arith.extf %7 : vector<16x128xbf16> to vector<16x128xf32>
    %9 = arith.addf %6, %8 : vector<16x128xf32>
    %10 = vector.extract_strided_slice %0 {offsets = [1, 0], sizes = [1, 128], strides = [1, 1]} : vector<3x128xf32> to vector<1x128xf32>
    %11 = vector.extract_strided_slice %0 {offsets = [2, 0], sizes = [1, 128], strides = [1, 1]} : vector<3x128xf32> to vector<1x128xf32>
    %cst_7 = arith.constant dense<0.000000e+00> : vector<16xf32>
    %12 = vector.multi_reduction <add>, %9, %cst_7 [1] : vector<16x128xf32> to vector<16xf32>
    %13 = vector.shape_cast %12 : vector<16xf32> to vector<16x1xf32>
    %cst_8 = arith.constant 1.280000e+02 : f32
    %14 = vector.broadcast %cst_8 : f32 to vector<16x1xf32>
    %15 = arith.divf %13, %14 : vector<16x1xf32>
    %16 = vector.broadcast %15 : vector<16x1xf32> to vector<16x128xf32>
    %17 = arith.subf %9, %16 : vector<16x128xf32>
    %18 = arith.mulf %17, %17 : vector<16x128xf32>
    %cst_9 = arith.constant dense<0.000000e+00> : vector<16xf32>
    %19 = vector.multi_reduction <add>, %18, %cst_9 [1] : vector<16x128xf32> to vector<16xf32>
    %20 = vector.shape_cast %19 : vector<16xf32> to vector<16x1xf32>
    %cst_10 = arith.constant 1.280000e+02 : f32
    %21 = vector.broadcast %cst_10 : f32 to vector<16x1xf32>
    %22 = arith.divf %20, %21 : vector<16x1xf32>
    %23 = vector.broadcast %15 : vector<16x1xf32> to vector<16x128xf32>
    %24 = arith.subf %9, %23 : vector<16x128xf32>
    %cst_11 = arith.constant 9.99999996E-13 : f32
    %25 = vector.broadcast %cst_11 : f32 to vector<16x1xf32>
    %26 = arith.addf %22, %25 : vector<16x1xf32>
    %27 = math.rsqrt %26 : vector<16x1xf32>
    %28 = vector.broadcast %27 : vector<16x1xf32> to vector<16x128xf32>
    %29 = arith.mulf %24, %28 : vector<16x128xf32>
    %30 = vector.broadcast %10 : vector<1x128xf32> to vector<16x128xf32>
    %31 = arith.mulf %29, %30 : vector<16x128xf32>
    %32 = vector.broadcast %11 : vector<1x128xf32> to vector<16x128xf32>
    %33 = arith.addf %31, %32 : vector<16x128xf32>
    %34 = arith.truncf %33 : vector<16x128xf32> to vector<16x128xbf16>
    %c0_12 = arith.constant 0 : index
    %c0_13 = arith.constant 0 : index
    %35 = vector.load %arg5[%c0_12, %c0_13] : memref<16x128xbf16, #tpu.memory_space<vmem>>, vector<16x128xbf16>
    tpu.vector_store %arg5[%c0_12, %c0_13], %34 {strides = array<i32>} : memref<16x128xbf16, #tpu.memory_space<vmem>>, vector<16x128xbf16>,
    return
  }
  func.func @transform_0(%arg0: i32) -> (i32, i32) {
    %c0_i32 = arith.constant 0 : i32
    %c0_i32_0 = arith.constant 0 : i32
    return %arg0, %c0_i32 : i32, i32
  }
  func.func @transform_1(%arg0: i32) -> (i32, i32) {
    %c0_i32 = arith.constant 0 : i32
    %c0_i32_0 = arith.constant 0 : i32
    return %arg0, %c0_i32 : i32, i32
  }
  func.func @transform_2(%arg0: i32) -> (i32, i32) {
    %c0_i32 = arith.constant 0 : i32
    %c0_i32_0 = arith.constant 0 : i32
    %c0_i32_1 = arith.constant 0 : i32
    return %c0_i32, %c0_i32_0 : i32, i32
  }
  func.func @transform_3(%arg0: i32) -> (i32, i32) {
    %c0_i32 = arith.constant 0 : i32
    %c0_i32_0 = arith.constant 0 : i32
    %c0_i32_1 = arith.constant 0 : i32
    return %c0_i32, %c0_i32_0 : i32, i32
  }
  func.func @transform_4(%arg0: i32) -> (i32, i32) {
    %c0_i32 = arith.constant 0 : i32
    %c0_i32_0 = arith.constant 0 : i32
    return %arg0, %c0_i32 : i32, i32
  }
}

module attributes {stable_mosaic.version = 11 : i64} {
  func.func @_ffn_kernel(%arg0: i32, %arg1: i32, %arg2: memref<16x128xbf16, #tpu.memory_space<vmem>>, %arg3: memref<128x512xbf16, #tpu.memory_space<vmem>>, %arg4: memref<1x512xf32, #tpu.memory_space<vmem>>, %arg5: memref<512x128xbf16, #tpu.memory_space<vmem>>, %arg6: memref<3x128xf32, #tpu.memory_space<vmem>>, %arg7: memref<16x128xbf16, #tpu.memory_space<vmem>>, %arg8: memref<16x128xf32, #tpu.memory_space<vmem>>) attributes {dimension_semantics = [#tpu.dimension_semantics<parallel>, #tpu.dimension_semantics<arbitrary>], iteration_bounds = array<i64: 1, 1>, scalar_prefetch = 0 : i64, scratch_operands = 1 : i64, tpu.core_type = #tpu.core_type<tc>, window_params = [{transform_indices = @transform_0, window_bounds = array<i64: 16, 128>}, {transform_indices = @transform_1, window_bounds = array<i64: 128, 512>}, {transform_indices = @transform_2, window_bounds = array<i64: 1, 512>}, {transform_indices = @transform_3, window_bounds = array<i64: 512, 128>}, {pipeline_mode = #tpu.pipeline_mode<synchronous>, transform_indices = @transform_4, window_bounds = array<i64: 3, 128>}, {transform_indices = @transform_5, window_bounds = array<i64: 16, 128>}]} {
    %c0_i32 = arith.constant 0 : i32
    %0 = arith.cmpi eq, %arg1, %c0_i32 : i32
    %1 = arith.extui %0 : i1 to i32
    %c0_i32_0 = arith.constant 0 : i32
    %2 = arith.cmpi ne, %1, %c0_i32_0 : i32
    scf.if %2 {
      %cst_19 = arith.constant 0.000000e+00 : f32
      %31 = vector.broadcast %cst_19 : f32 to vector<16x128xf32>
      %c0_20 = arith.constant 0 : index
      %c0_21 = arith.constant 0 : index
      %32 = vector.load %arg8[%c0_20, %c0_21] : memref<16x128xf32, #tpu.memory_space<vmem>>, vector<16x128xf32>
      tpu.vector_store %arg8[%c0_20, %c0_21], %31 {strides = array<i32>} : memref<16x128xf32, #tpu.memory_space<vmem>>, vector<16x128xf32>,
    } else {
    }
    %c0 = arith.constant 0 : index
    %c0_1 = arith.constant 0 : index
    %3 = vector.load %arg2[%c0, %c0_1] : memref<16x128xbf16, #tpu.memory_space<vmem>>, vector<16x128xbf16>
    %c0_2 = arith.constant 0 : index
    %c0_3 = arith.constant 0 : index
    %4 = vector.load %arg3[%c0_2, %c0_3] : memref<128x512xbf16, #tpu.memory_space<vmem>>, vector<128x512xbf16>
    %cst = arith.constant dense<0.000000e+00> : vector<16x512xf32>
    %5 = tpu.matmul %3, %4, %cst {dimension_numbers = #tpu.dot_dimension_numbers<[1], [0], [0], [1], [0, 0, 1, 1], [], []>} : vector<16x128xbf16>, vector<128x512xbf16>, vector<16x512xf32> -> vector<16x512xf32>
    %c0_4 = arith.constant 0 : index
    %c0_5 = arith.constant 0 : index
    %6 = vector.load %arg4[%c0_4, %c0_5] : memref<1x512xf32, #tpu.memory_space<vmem>>, vector<1x512xf32>
    %7 = vector.broadcast %6 : vector<1x512xf32> to vector<16x512xf32>
    %8 = arith.addf %5, %7 : vector<16x512xf32>
    %cst_6 = arith.constant 5.000000e-01 : f32
    %9 = vector.broadcast %cst_6 : f32 to vector<16x512xf32>
    %10 = arith.mulf %9, %8 : vector<16x512xf32>
    %cst_7 = arith.constant 4.471500e-02 : f32
    %11 = vector.broadcast %cst_7 : f32 to vector<16x512xf32>
    %12 = arith.mulf %11, %8 : vector<16x512xf32>
    %13 = arith.mulf %12, %8 : vector<16x512xf32>
    %14 = arith.mulf %13, %8 : vector<16x512xf32>
    %15 = arith.addf %8, %14 : vector<16x512xf32>
    %cst_8 = arith.constant 0.797884583 : f32
    %16 = vector.broadcast %cst_8 : f32 to vector<16x512xf32>
    %17 = arith.mulf %16, %15 : vector<16x512xf32>
    %18 = math.tanh %17 : vector<16x512xf32>
    %cst_9 = arith.constant 1.000000e+00 : f32
    %19 = vector.broadcast %cst_9 : f32 to vector<16x512xf32>
    %20 = arith.addf %19, %18 : vector<16x512xf32>
    %21 = arith.mulf %10, %20 : vector<16x512xf32>
    %c0_10 = arith.constant 0 : index
    %c0_11 = arith.constant 0 : index
    %22 = vector.load %arg8[%c0_10, %c0_11] : memref<16x128xf32, #tpu.memory_space<vmem>>, vector<16x128xf32>
    %23 = arith.truncf %21 : vector<16x512xf32> to vector<16x512xbf16>
    %c0_12 = arith.constant 0 : index
    %c0_13 = arith.constant 0 : index
    %24 = vector.load %arg5[%c0_12, %c0_13] : memref<512x128xbf16, #tpu.memory_space<vmem>>, vector<512x128xbf16>
    %cst_14 = arith.constant dense<0.000000e+00> : vector<16x128xf32>
    %25 = tpu.matmul %23, %24, %cst_14 {dimension_numbers = #tpu.dot_dimension_numbers<[1], [0], [0], [1], [0, 0, 1, 1], [], []>} : vector<16x512xbf16>, vector<512x128xbf16>, vector<16x128xf32> -> vector<16x128xf32>
    %26 = arith.addf %22, %25 : vector<16x128xf32>
    %c0_15 = arith.constant 0 : index
    %c0_16 = arith.constant 0 : index
    %27 = vector.load %arg8[%c0_15, %c0_16] : memref<16x128xf32, #tpu.memory_space<vmem>>, vector<16x128xf32>
    tpu.vector_store %arg8[%c0_15, %c0_16], %26 {strides = array<i32>} : memref<16x128xf32, #tpu.memory_space<vmem>>, vector<16x128xf32>,
    %c0_i32_17 = arith.constant 0 : i32
    %28 = arith.cmpi eq, %arg1, %c0_i32_17 : i32
    %29 = arith.extui %28 : i1 to i32
    %c0_i32_18 = arith.constant 0 : i32
    %30 = arith.cmpi ne, %29, %c0_i32_18 : i32
    scf.if %30 {
      %c0_19 = arith.constant 0 : index
      %c0_20 = arith.constant 0 : index
      %31 = vector.load %arg6[%c0_19, %c0_20] : memref<3x128xf32, #tpu.memory_space<vmem>>, vector<3x128xf32>
      %c0_21 = arith.constant 0 : index
      %c0_22 = arith.constant 0 : index
      %32 = vector.load %arg8[%c0_21, %c0_22] : memref<16x128xf32, #tpu.memory_space<vmem>>, vector<16x128xf32>
      %33 = vector.extract_strided_slice %31 {offsets = [0, 0], sizes = [1, 128], strides = [1, 1]} : vector<3x128xf32> to vector<1x128xf32>
      %34 = vector.broadcast %33 : vector<1x128xf32> to vector<16x128xf32>
      %35 = arith.addf %32, %34 : vector<16x128xf32>
      %36 = arith.extf %3 : vector<16x128xbf16> to vector<16x128xf32>
      %37 = arith.addf %35, %36 : vector<16x128xf32>
      %38 = vector.extract_strided_slice %31 {offsets = [1, 0], sizes = [1, 128], strides = [1, 1]} : vector<3x128xf32> to vector<1x128xf32>
      %39 = vector.extract_strided_slice %31 {offsets = [2, 0], sizes = [1, 128], strides = [1, 1]} : vector<3x128xf32> to vector<1x128xf32>
      %cst_23 = arith.constant dense<0.000000e+00> : vector<16xf32>
      %40 = vector.multi_reduction <add>, %37, %cst_23 [1] : vector<16x128xf32> to vector<16xf32>
      %41 = vector.shape_cast %40 : vector<16xf32> to vector<16x1xf32>
      %cst_24 = arith.constant 1.280000e+02 : f32
      %42 = vector.broadcast %cst_24 : f32 to vector<16x1xf32>
      %43 = arith.divf %41, %42 : vector<16x1xf32>
      %44 = vector.broadcast %43 : vector<16x1xf32> to vector<16x128xf32>
      %45 = arith.subf %37, %44 : vector<16x128xf32>
      %46 = arith.mulf %45, %45 : vector<16x128xf32>
      %cst_25 = arith.constant dense<0.000000e+00> : vector<16xf32>
      %47 = vector.multi_reduction <add>, %46, %cst_25 [1] : vector<16x128xf32> to vector<16xf32>
      %48 = vector.shape_cast %47 : vector<16xf32> to vector<16x1xf32>
      %cst_26 = arith.constant 1.280000e+02 : f32
      %49 = vector.broadcast %cst_26 : f32 to vector<16x1xf32>
      %50 = arith.divf %48, %49 : vector<16x1xf32>
      %51 = vector.broadcast %43 : vector<16x1xf32> to vector<16x128xf32>
      %52 = arith.subf %37, %51 : vector<16x128xf32>
      %cst_27 = arith.constant 9.99999996E-13 : f32
      %53 = vector.broadcast %cst_27 : f32 to vector<16x1xf32>
      %54 = arith.addf %50, %53 : vector<16x1xf32>
      %55 = math.rsqrt %54 : vector<16x1xf32>
      %56 = vector.broadcast %55 : vector<16x1xf32> to vector<16x128xf32>
      %57 = arith.mulf %52, %56 : vector<16x128xf32>
      %58 = vector.broadcast %38 : vector<1x128xf32> to vector<16x128xf32>
      %59 = arith.mulf %57, %58 : vector<16x128xf32>
      %60 = vector.broadcast %39 : vector<1x128xf32> to vector<16x128xf32>
      %61 = arith.addf %59, %60 : vector<16x128xf32>
      %62 = arith.truncf %61 : vector<16x128xf32> to vector<16x128xbf16>
      %c0_28 = arith.constant 0 : index
      %c0_29 = arith.constant 0 : index
      %63 = vector.load %arg7[%c0_28, %c0_29] : memref<16x128xbf16, #tpu.memory_space<vmem>>, vector<16x128xbf16>
      tpu.vector_store %arg7[%c0_28, %c0_29], %62 {strides = array<i32>} : memref<16x128xbf16, #tpu.memory_space<vmem>>, vector<16x128xbf16>,
    } else {
    }
    return
  }
  func.func @transform_0(%arg0: i32, %arg1: i32) -> (i32, i32) {
    %c0_i32 = arith.constant 0 : i32
    %c0_i32_0 = arith.constant 0 : i32
    return %arg0, %c0_i32 : i32, i32
  }
  func.func @transform_1(%arg0: i32, %arg1: i32) -> (i32, i32) {
    %c0_i32 = arith.constant 0 : i32
    %c0_i32_0 = arith.constant 0 : i32
    return %c0_i32, %arg1 : i32, i32
  }
  func.func @transform_2(%arg0: i32, %arg1: i32) -> (i32, i32) {
    %c0_i32 = arith.constant 0 : i32
    %c0_i32_0 = arith.constant 0 : i32
    return %c0_i32, %arg1 : i32, i32
  }
  func.func @transform_3(%arg0: i32, %arg1: i32) -> (i32, i32) {
    %c0_i32 = arith.constant 0 : i32
    %c0_i32_0 = arith.constant 0 : i32
    return %arg1, %c0_i32 : i32, i32
  }
  func.func @transform_4(%arg0: i32, %arg1: i32) -> (i32, i32) {
    %c0_i32 = arith.constant 0 : i32
    %c0_i32_0 = arith.constant 0 : i32
    %c0_i32_1 = arith.constant 0 : i32
    return %c0_i32, %c0_i32_0 : i32, i32
  }
  func.func @transform_5(%arg0: i32, %arg1: i32) -> (i32, i32) {
    %c0_i32 = arith.constant 0 : i32
    %c0_i32_0 = arith.constant 0 : i32
    return %arg0, %c0_i32 : i32, i32
  }
}

module attributes {stable_mosaic.version = 11 : i64} {
  func.func @_ln_kernel(%arg0: i32, %arg1: memref<16x128xf32, #tpu.memory_space<vmem>>, %arg2: memref<2x128xf32, #tpu.memory_space<vmem>>, %arg3: memref<16x128xbf16, #tpu.memory_space<vmem>>) attributes {dimension_semantics = [#tpu.dimension_semantics<parallel>], iteration_bounds = array<i64: 1>, scalar_prefetch = 0 : i64, scratch_operands = 0 : i64, tpu.core_type = #tpu.core_type<tc>, window_params = [{transform_indices = @transform_0, window_bounds = array<i64: 16, 128>}, {pipeline_mode = #tpu.pipeline_mode<synchronous>, transform_indices = @transform_1, window_bounds = array<i64: 2, 128>}, {transform_indices = @transform_2, window_bounds = array<i64: 16, 128>}]} {
    %c0 = arith.constant 0 : index
    %c0_0 = arith.constant 0 : index
    %0 = vector.load %arg2[%c0, %c0_0] : memref<2x128xf32, #tpu.memory_space<vmem>>, vector<2x128xf32>
    %c0_1 = arith.constant 0 : index
    %c0_2 = arith.constant 0 : index
    %1 = vector.load %arg1[%c0_1, %c0_2] : memref<16x128xf32, #tpu.memory_space<vmem>>, vector<16x128xf32>
    %2 = vector.extract_strided_slice %0 {offsets = [0, 0], sizes = [1, 128], strides = [1, 1]} : vector<2x128xf32> to vector<1x128xf32>
    %3 = vector.extract_strided_slice %0 {offsets = [1, 0], sizes = [1, 128], strides = [1, 1]} : vector<2x128xf32> to vector<1x128xf32>
    %cst = arith.constant dense<0.000000e+00> : vector<16xf32>
    %4 = vector.multi_reduction <add>, %1, %cst [1] : vector<16x128xf32> to vector<16xf32>
    %5 = vector.shape_cast %4 : vector<16xf32> to vector<16x1xf32>
    %cst_3 = arith.constant 1.280000e+02 : f32
    %6 = vector.broadcast %cst_3 : f32 to vector<16x1xf32>
    %7 = arith.divf %5, %6 : vector<16x1xf32>
    %8 = vector.broadcast %7 : vector<16x1xf32> to vector<16x128xf32>
    %9 = arith.subf %1, %8 : vector<16x128xf32>
    %10 = arith.mulf %9, %9 : vector<16x128xf32>
    %cst_4 = arith.constant dense<0.000000e+00> : vector<16xf32>
    %11 = vector.multi_reduction <add>, %10, %cst_4 [1] : vector<16x128xf32> to vector<16xf32>
    %12 = vector.shape_cast %11 : vector<16xf32> to vector<16x1xf32>
    %cst_5 = arith.constant 1.280000e+02 : f32
    %13 = vector.broadcast %cst_5 : f32 to vector<16x1xf32>
    %14 = arith.divf %12, %13 : vector<16x1xf32>
    %15 = vector.broadcast %7 : vector<16x1xf32> to vector<16x128xf32>
    %16 = arith.subf %1, %15 : vector<16x128xf32>
    %cst_6 = arith.constant 9.99999996E-13 : f32
    %17 = vector.broadcast %cst_6 : f32 to vector<16x1xf32>
    %18 = arith.addf %14, %17 : vector<16x1xf32>
    %19 = math.rsqrt %18 : vector<16x1xf32>
    %20 = vector.broadcast %19 : vector<16x1xf32> to vector<16x128xf32>
    %21 = arith.mulf %16, %20 : vector<16x128xf32>
    %22 = vector.broadcast %2 : vector<1x128xf32> to vector<16x128xf32>
    %23 = arith.mulf %21, %22 : vector<16x128xf32>
    %24 = vector.broadcast %3 : vector<1x128xf32> to vector<16x128xf32>
    %25 = arith.addf %23, %24 : vector<16x128xf32>
    %26 = arith.truncf %25 : vector<16x128xf32> to vector<16x128xbf16>
    %c0_7 = arith.constant 0 : index
    %c0_8 = arith.constant 0 : index
    %27 = vector.load %arg3[%c0_7, %c0_8] : memref<16x128xbf16, #tpu.memory_space<vmem>>, vector<16x128xbf16>
    tpu.vector_store %arg3[%c0_7, %c0_8], %26 {strides = array<i32>} : memref<16x128xbf16, #tpu.memory_space<vmem>>, vector<16x128xbf16>,
    return
  }
  func.func @transform_0(%arg0: i32) -> (i32, i32) {
    %c0_i32 = arith.constant 0 : i32
    %c0_i32_0 = arith.constant 0 : i32
    return %arg0, %c0_i32 : i32, i32
  }
  func.func @transform_1(%arg0: i32) -> (i32, i32) {
    %c0_i32 = arith.constant 0 : i32
    %c0_i32_0 = arith.constant 0 : i32
    %c0_i32_1 = arith.constant 0 : i32
    return %c0_i32, %c0_i32_0 : i32, i32
  }
  func.func @transform_2(%arg0: i32) -> (i32, i32) {
    %c0_i32 = arith.constant 0 : i32
    %c0_i32_0 = arith.constant 0 : i32
    return %arg0, %c0_i32 : i32, i32
  }
}

</mosaic_0001>

<bundles_post_ra>
// kernel: bert_encoder_forward.9
= control target key start
LH: loop header
LB: loop body
LE: loop exit
PB: predicated region body
PF: predicated region fallthrough
CT: control target
= control target key end

     0   :  { %v257_v0 = vmov 0.0   ;;  %vm258_vm0 = vmmov 0   ;;  %v37_v10 = vlaneseq  ;;  %s320_s2 = inlined_call_operand.vmem [shape: bf16[128,128], index: 2, kind: input, shape index: {}]   ;;  %s321_s0 = inlined_call_operand.vmem [shape: bf16[16,128], index: 0, kind: input, shape index: {}]   ;;  %s322_s3 = inlined_call_operand.vmem [shape: f32[3,128], index: 3, kind: input, shape index: {}]   ;;  %s323_s1 = inlined_call_operand.vmem [shape: bf16[16,128], index: 1, kind: input, shape index: {}]   ;;  %s324_s4 = inlined_call_operand.vmem [shape: bf16[16,128], index: 4, kind: output, shape index: {}]  }
   0x1   :  { %222 = vmatprep.subr.bf16.mxu0 %v257_v0  ;;  %v244_v1 = vld [vmem:[%s320_s2] sm:$0xff]   ;;  %238 = vmatprep.mubr.msk.bf16.mxu0 %vm258_vm0, %v257_v0  ;;  %v245_v2 = vld [vmem:[%s320_s2 + $0x8] sm:$0xff]   ;;  %v246_v3 = vld [vmem:[%s320_s2 + $0x10] sm:$0xff]  }
   0x2   :  { %223 = vmatpush3.bf16.msra.mxu0 %v244_v1  ;;  %v247_v4 = vld [vmem:[%s320_s2 + $0x18] sm:$0xff]   ;;  %v248_v5 = vld [vmem:[%s320_s2 + $0x20] sm:$0xff]   ;;  %v249_v6 = vld [vmem:[%s320_s2 + $0x28] sm:$0xff]   ;;  %v38_v11 = vshrl.u32 %v37_v10, 7 }
   0x3   :  { %224 = vmatprep.subr.bf16.mxu0 %v257_v0  ;;  %v250_v7 = vld [vmem:[%s320_s2 + $0x30] sm:$0xff]   ;;  %v251_v8 = vld [vmem:[%s320_s2 + $0x38] sm:$0xff]   ;;  %v252_v9 = vld [vmem:[%s321_s0] sm:$0xff]  }
   0x4   :  { %v39_v12 = vsub.s32 0, %v38_v11  ;;  %v18_v13 = vld [vmem:[%s322_s3] sm:$0x7]  ;;  %v167_v40 = vsub.s32 1, %v38_v11  ;;  %v173_v43 = vsub.s32 2, %v38_v11 }
   0x5   :  { %v205_v14 = vld [vmem:[%s323_s1] sm:$0xff]  }
   0x6   :  { %225 = vmatpush3.bf16.msra.mxu0 %v245_v2  ;;  %v40_v15 = vrot.slane %v18_v13, %v39_v12  ;;  %v206_v16 = vunpack.c.l.bf16 %v205_v14  ;;  %v207_v24 = vunpack.c.h.bf16 %v205_v14  ;;  %v168_v42 = vrot.slane %v18_v13, %v167_v40 }
   0x7   :  { %226 = vmatprep.subr.bf16.mxu0 %v257_v0  ;;  %v174_v46 = vrot.slane %v18_v13, %v173_v43 }
   0xa   :  { %227 = vmatpush3.bf16.msra.mxu0 %v246_v3 }
   0xb   :  { %228 = vmatprep.subr.bf16.mxu0 %v257_v0 }
   0xe   :  { %229 = vmatpush3.bf16.msra.mxu0 %v247_v4 }
   0xf   :  { %230 = vmatprep.subr.bf16.mxu0 %v257_v0 }
  0x12   :  { %231 = vmatpush3.bf16.msra.mxu0 %v248_v5 }
  0x13   :  { %232 = vmatprep.subr.bf16.mxu0 %v257_v0 }
  0x16   :  { %233 = vmatpush3.bf16.msra.mxu0 %v249_v6 }
  0x17   :  { %234 = vmatprep.subr.bf16.mxu0 %v257_v0 }
  0x1a   :  { %235 = vmatpush3.bf16.msra.mxu0 %v250_v7 }
  0x1b   :  { %236 = vmatprep.subr.bf16.mxu0 %v257_v0 }
  0x1e   :  { %237 = vmatpush3.bf16.msra.mxu0 %v251_v8 }
  0x21   :  { %239 = vmatmul.mubr.bf16.vlgmr.msra.gmra.mrb[0].mxu0 %v252_v9 }
  0xf4   :  { %v129_v17 = vpop.f32.mrb[0].mxu0 }
  0xf5   :  { %v130_v18 = vadd.f32 %v129_v17, %v40_v15  ;;  %v240_v19 = vpop.f32.mrb[1].mxu0 }
  0xf6   :  { %v132_v20 = vpop.f32.mrb[2].mxu0 }
  0xf7   :  { %v133_v21 = vadd.f32 %v132_v20, %v40_v15  ;;  %v241_v22 = vpop.f32.mrb[3].mxu0  ;;  %v140_v23 = vadd.f32 %v206_v16, %v130_v18 }
  0xf9   :  { %142 = vadd.xlane.f32.xlu0 %v140_v23  ;;  %v141_v25 = vadd.f32 %v207_v24, %v133_v21 }
  0xfd   :  { %144 = vadd.xlane.f32.xlu0 %v141_v25 }
 0x186   :  { %v143_v26 = vpop.xlane.xlu0 %142 }
 0x187   :  { %v147_v27 = vmul.f32 0.0078125, %v143_v26 }
 0x189   :  { %v149_v28 = vsub.f32 %v140_v23, %v147_v27 }
 0x18a   :  { %v145_v29 = vpop.xlane.xlu0 %144 }
 0x18b   :  { %v148_v30 = vmul.f32 0.0078125, %v145_v29  ;;  %v151_v31 = vmul.f32 %v149_v28, %v149_v28 }
 0x18d   :  { %v150_v32 = vsub.f32 %v141_v25, %v148_v30  ;;  %153 = vadd.xlane.f32.xlu1 %v151_v31 }
 0x18f   :  { %v152_v33 = vmul.f32 %v150_v32, %v150_v32 }
 0x191   :  { %155 = vadd.xlane.f32.xlu1 %v152_v33 }
 0x21a   :  { %v154_v34 = vpop.xlane.xlu1 %153 }
 0x21b   :  { %v157_v35 = vmul.f32 0.0078125, %v154_v34 }
 0x21d   :  { %v159_v36 = vadd.f32 1e-12, %v157_v35 }
 0x21e   :  { %v156_v37 = vpop.xlane.xlu1 %155 }
 0x21f   :  { %253 = vrsqrt.f32 %v159_v36  ;;  %v158_v38 = vmul.f32 0.0078125, %v156_v37 }
 0x221   :  { %v160_v39 = vadd.f32 1e-12, %v158_v38 }
 0x223   :  { %255 = vrsqrt.f32 %v160_v39 }
 0x229   :  { %v254_v41 = vpop.eup %253 }
 0x22a   :  { %v163_v44 = vmul.f32 %v254_v41, %v149_v28 }
 0x22c   :  { %v169_v47 = vmul.f32 %v168_v42, %v163_v44 }
 0x22d   :  { %v256_v45 = vpop.eup %255 }
 0x22e   :  { %v164_v48 = vmul.f32 %v256_v45, %v150_v32  ;;  %v175_v50 = vadd.f32 %v174_v46, %v169_v47 }
 0x230   :  { %v170_v49 = vmul.f32 %v168_v42, %v164_v48 }
 0x232   :  { %v176_v51 = vadd.f32 %v174_v46, %v170_v49 }
 0x234   :  { %v211_v52 = vpack.c.bf16 %v176_v51, %v175_v50 }
 0x236   :  { %212 = vst [vmem:[%s324_s4] sm:$0xff] %v211_v52  }

// kernel: bert_encoder_forward.7
= control target key start
LH: loop header
LB: loop body
LE: loop exit
PB: predicated region body
PF: predicated region fallthrough
CT: control target
= control target key end

     0   :  { %v37_v13 = vlaneseq  ;;  %s103_s0 = inlined_call_operand.vmem [shape: f32[16,128], index: 0, kind: input, shape index: {}]   ;;  %s104_s1 = inlined_call_operand.vmem [shape: f32[2,128], index: 1, kind: input, shape index: {}]   ;;  %s105_s2 = inlined_call_operand.vmem [shape: bf16[16,128], index: 2, kind: output, shape index: {}]  }
   0x1   :  { %v12_v0 = vld [vmem:[%s103_s0] sm:$0xff]  ;;  %v13_v1 = vld [vmem:[%s103_s0 + $0x8] sm:$0xff] }
   0x2   :  { %14 = vadd.xlane.f32.xlu0 %v12_v0  ;;  %v38_v17 = vshrl.u32 %v37_v13, 7  ;;  %v11_v19 = vld [vmem:[%s104_s1] sm:$0x3] }
   0x4   :  { %v39_v18 = vsub.s32 0, %v38_v17  ;;  %v45_v22 = vsub.s32 1, %v38_v17 }
   0x6   :  { %16 = vadd.xlane.f32.xlu0 %v13_v1  ;;  %v40_v21 = vrot.slane %v11_v19, %v39_v18  ;;  %v46_v25 = vrot.slane %v11_v19, %v45_v22 }
  0x8f   :  { %v15_v2 = vpop.xlane.xlu0 %14 }
  0x90   :  { %v19_v3 = vmul.f32 0.0078125, %v15_v2 }
  0x92   :  { %v21_v4 = vsub.f32 %v12_v0, %v19_v3 }
  0x93   :  { %v17_v5 = vpop.xlane.xlu0 %16 }
  0x94   :  { %v20_v6 = vmul.f32 0.0078125, %v17_v5  ;;  %v23_v7 = vmul.f32 %v21_v4, %v21_v4 }
  0x96   :  { %v22_v8 = vsub.f32 %v13_v1, %v20_v6  ;;  %25 = vadd.xlane.f32.xlu1 %v23_v7 }
  0x98   :  { %v24_v9 = vmul.f32 %v22_v8, %v22_v8 }
  0x9a   :  { %27 = vadd.xlane.f32.xlu1 %v24_v9 }
 0x123   :  { %v26_v10 = vpop.xlane.xlu1 %25 }
 0x124   :  { %v29_v11 = vmul.f32 0.0078125, %v26_v10 }
 0x126   :  { %v31_v12 = vadd.f32 1e-12, %v29_v11 }
 0x127   :  { %v28_v14 = vpop.xlane.xlu1 %27 }
 0x128   :  { %72 = vrsqrt.f32 %v31_v12  ;;  %v30_v15 = vmul.f32 0.0078125, %v28_v14 }
 0x12a   :  { %v32_v16 = vadd.f32 1e-12, %v30_v15 }
 0x12c   :  { %74 = vrsqrt.f32 %v32_v16 }
 0x132   :  { %v73_v20 = vpop.eup %72 }
 0x133   :  { %v35_v23 = vmul.f32 %v73_v20, %v21_v4 }
 0x135   :  { %v41_v26 = vmul.f32 %v40_v21, %v35_v23 }
 0x136   :  { %v75_v24 = vpop.eup %74 }
 0x137   :  { %v36_v27 = vmul.f32 %v75_v24, %v22_v8  ;;  %v47_v29 = vadd.f32 %v46_v25, %v41_v26 }
 0x139   :  { %v42_v28 = vmul.f32 %v40_v21, %v36_v27 }
 0x13b   :  { %v48_v30 = vadd.f32 %v46_v25, %v42_v28 }
 0x13d   :  { %v70_v31 = vpack.c.bf16 %v48_v30, %v47_v29 }
 0x13f   :  { %71 = vst [vmem:[%s105_s2] sm:$0xff] %v70_v31  }

// kernel: bert_encoder_forward.8
= control target key start
LH: loop header
LB: loop body
LE: loop exit
PB: predicated region body
PF: predicated region fallthrough
CT: control target
= control target key end

     0   :  { %s1098_s15 = smov 0   ;;  %s1100_s16 = smov 0   ;;  %s1270_s0 = inlined_call_operand.vmem [shape: bf16[2,8,128], index: 0, kind: input, shape index: {}]   ;;  %s1271_s1 = inlined_call_operand.vmem [shape: bf16[1,128,384], index: 1, kind: input, shape index: {}]   ;;  %s1272_s2 = inlined_call_operand.vmem [shape: f32[1,384], index: 2, kind: input, shape index: {}]   ;;  %s1273_s3 = inlined_call_operand.vmem [shape: f32[2,1,8], index: 3, kind: input, shape index: {}]   ;;  %s1274_s4 = inlined_call_operand.vmem [shape: bf16[2,8,128], index: 4, kind: output, shape index: {}]  }
   0x1   :  { %s1102_s17 = smov 0  }
   0x2 LB: > { %s26_s18 = sadd.s32 1, %s1063_s16  ;;  %p882_p0 = scmp.ge.s32.totalorder %s1067_s17, 1  ;;  %s1067_s17 = sphi %s1102_s17, %s14_s17   ;;  %s1063_s16 = sphi %s1100_s16, %s1276_s16   ;;  %s1059_s15 = sphi %s1098_s15, %s1275_s15  }
   0x3   : > { %p28_p1 = scmp.ge.s32.totalorder %s26_s18, 2  ;;  %p202_p2 = scmp.lt.s32.totalorder %s1067_s17, 3 }
   0x5   : > { %s1278_s18 = smov (%p28_p1, %s26_s18), 0  ;;  %p203_p3 = pnand %p882_p0, %p202_p2 }
   0x6   : > { %v1005_v0 = vld [vmem:[%s1271_s1 + $0x4] ss:$12 sps:$4 sm:$0xff] (!%p203_p3)   ;;  %v1007_v1 = vld [vmem:[%s1271_s1] ss:$12 sps:$4 sm:$0xff] (!%p203_p3)   ;;  %v1069_v2 = vmov (!%p203_p3), 0   ;;  %p241_p4 = scmp.lt.s32.totalorder (!%p203_p3), %s1059_s15, 1  ;;  %v300_v19 = vlaneseq (!%p203_p3) }
   0x7   : > { %206 = sbr.rel (%p203_p3) target bundleno = 1242 (0x4da), region = 36  ;;  %475 = vmatprep.mubr.bf16.mxu0 (!%p203_p3), %v1069_v2  ;;  %443 = vmatprep.subr.bf16.mxu0 (!%p203_p3), %v1005_v0  ;;  %v1008_v3 = vld [vmem:[%s1271_s1 + $0x1c] ss:$12 sps:$4 sm:$0xff] (!%p203_p3)   ;;  %v1010_v4 = vld [vmem:[%s1271_s1 + $0x18] ss:$12 sps:$4 sm:$0xff] (!%p203_p3)   ;;  %v1070_v18 = vmov (!%p203_p3), 0.0  }
   0x8   : > { %444 = vmatpush1.bf16.msra.mxu0 (!%p203_p3), %v1007_v1  ;;  %v1011_v5 = vld [vmem:[%s1271_s1 + $0x34] ss:$12 sps:$4 sm:$0xff] (!%p203_p3)   ;;  %v1013_v6 = vld [vmem:[%s1271_s1 + $0x30] ss:$12 sps:$4 sm:$0xff] (!%p203_p3)   ;;  %v1014_v7 = vld [vmem:[%s1271_s1 + $0x4c] ss:$12 sps:$4 sm:$0xff] (!%p203_p3)   ;;  %933 = vmatprep.subr.bf16.mxu1 (!%p203_p3), %v1070_v18 }
   0x9   : > { %445 = vmatprep.subr.bf16.mxu0 (!%p203_p3), %v1008_v3  ;;  %v1016_v8 = vld [vmem:[%s1271_s1 + $0x48] ss:$12 sps:$4 sm:$0xff] (!%p203_p3)   ;;  %v1017_v9 = vld [vmem:[%s1271_s1 + $0x64] ss:$12 sps:$4 sm:$0xff] (!%p203_p3)   ;;  %v1019_v10 = vld [vmem:[%s1271_s1 + $0x60] ss:$12 sps:$4 sm:$0xff] (!%p203_p3)  }
   0xa   : > { %v1020_v11 = vld [vmem:[%s1271_s1 + $0x7c] ss:$12 sps:$4 sm:$0xff] (!%p203_p3)   ;;  %v1022_v12 = vld [vmem:[%s1271_s1 + $0x78] ss:$12 sps:$4 sm:$0xff] (!%p203_p3)   ;;  %v1023_v13 = vld [vmem:[%s1271_s1 + $0x94] ss:$12 sps:$4 sm:$0xff] (!%p203_p3)  }
   0xb   : > { %v1025_v14 = vld [vmem:[%s1271_s1 + $0x90] ss:$12 sps:$4 sm:$0xff] (!%p203_p3)   ;;  %v1026_v15 = vld [vmem:[%s1271_s1 + $0xac] ss:$12 sps:$4 sm:$0xff] (!%p203_p3)   ;;  %v1028_v16 = vld [vmem:[%s1271_s1 + $0xa8] ss:$12 sps:$4 sm:$0xff] (!%p203_p3)  }
   0xc   : > { %446 = vmatpush1.bf16.msra.mxu0 (!%p203_p3), %v1010_v4  ;;  %vm1071_vm0 = vmmov (!%p203_p3), 0   ;;  %v1182_v20 = vshrl.u32 (!%p203_p3), %v300_v19, 7  ;;  %v1188_v22 = vld [vmem:[%s1272_s2] sm:$0x7] (!%p203_p3)  ;;  %vm534_vm1 = vcmask (!%p203_p3), 523264   ;;  %s1072_s9 = smov (!%p203_p3), 64  }
   0xd   : > { %447 = vmatprep.subr.bf16.mxu0 (!%p203_p3), %v1011_v5  ;;  %949 = vmatprep.mubr.msk.bf16.mxu1 (!%p203_p3), %vm1071_vm0, %v1070_v18  ;;  %v1029_v35 = vld [vmem:[%s1271_s1 + $0x8] ss:$12 sps:$4 sm:$0xff] (!%p203_p3)   ;;  %v1030_v36 = vld [vmem:[%s1271_s1 + $0x20] ss:$12 sps:$4 sm:$0xff] (!%p203_p3)   ;;  %v1031_v37 = vld [vmem:[%s1271_s1 + $0x38] ss:$12 sps:$4 sm:$0xff] (!%p203_p3)  }
   0xe   : > { %s1280_s15 = smov (!%p241_p4, %s1059_s15), 1  ;;  %v306_v21 = vsub.s32 1, %v1182_v20  ;;  %v302_v23 = vsub.s32 0, %v1182_v20  ;;  %934 = vmatpush3.bf16.msra.mxu1 %v1029_v35  ;;  %v1032_v38 = vld [vmem:[%s1271_s1 + $0x50] ss:$12 sps:$4 sm:$0xff]   ;;  %vm583_vm2 = vcmask 64512  }
   0xf   : > { %s883_s27 = sshll.u32 %s1280_s15, 2  ;;  %935 = vmatprep.subr.bf16.mxu1 %v1070_v18  ;;  %v1033_v39 = vld [vmem:[%s1271_s1 + $0x68] ss:$12 sps:$4 sm:$0xff]   ;;  %v1034_v42 = vld [vmem:[%s1271_s1 + $0x80] ss:$12 sps:$4 sm:$0xff]   ;;  %s256_s7 = scalar_lea.vmem %s1273_s3, %s1280_s15  ;;  %v310_v0 = vsub.s32 2, %v1182_v20 }
  0x10   : > { %448 = vmatpush1.bf16.msra.mxu0 %v1013_v6  ;;  %s244_s6 = scalar_lea.vmem %s1270_s0, %s883_s27  ;;  %v307_v24 = vrot.slane %v1188_v22, %v306_v21  ;;  %v303_v25 = vrot.slane %v1188_v22, %v302_v23  ;;  %v1035_v43 = vld [vmem:[%s1271_s1 + $0x98] ss:$12 sps:$4 sm:$0xff]   ;;  %v1036_v45 = vld [vmem:[%s1271_s1 + $0xb0] ss:$12 sps:$4 sm:$0xff]   ;;  %v909_v47 = vld [vmem:[%s256_s7] ss:$0 sm:$0xff]  ;;  %s263_s11 = scalar_lea.vmem %s1274_s4, %s883_s27 }
  0x11   : > { %449 = vmatprep.subr.bf16.mxu0 %v1014_v7  ;;  %v265_v17 = vld [vmem:[%s244_s6] sm:$0xf]  ;;  %v311_v3 = vrot.slane %v1188_v22, %v310_v0  ;;  %vm599_vm3 = vcmask 1043456  }
  0x12   : > { %936 = vmatpush3.bf16.msra.mxu1 %v1030_v36 }
  0x13   : > { %937 = vmatprep.subr.bf16.mxu1 %v1070_v18 }
  0x14   : > { %450 = vmatpush1.bf16.msra.mxu0 %v1016_v8 }
  0x15   : > { %451 = vmatprep.subr.bf16.mxu0 %v1017_v9 }
  0x16   : > { %938 = vmatpush3.bf16.msra.mxu1 %v1031_v37 }
  0x17   : > { %939 = vmatprep.subr.bf16.mxu1 %v1070_v18 }
  0x18   : > { %452 = vmatpush1.bf16.msra.mxu0 %v1019_v10 }
  0x19   : > { %453 = vmatprep.subr.bf16.mxu0 %v1020_v11 }
  0x1a   : > { %940 = vmatpush3.bf16.msra.mxu1 %v1032_v38 }
  0x1b   : > { %941 = vmatprep.subr.bf16.mxu1 %v1070_v18 }
  0x1c   : > { %454 = vmatpush1.bf16.msra.mxu0 %v1022_v12 }
  0x1d   : > { %455 = vmatprep.subr.bf16.mxu0 %v1023_v13 }
  0x1e   : > { %942 = vmatpush3.bf16.msra.mxu1 %v1033_v39 }
  0x1f   : > { %943 = vmatprep.subr.bf16.mxu1 %v1070_v18 }
  0x20   : > { %456 = vmatpush1.bf16.msra.mxu0 %v1025_v14 }
  0x21   : > { %457 = vmatprep.subr.bf16.mxu0 %v1026_v15 }
  0x22   : > { %944 = vmatpush3.bf16.msra.mxu1 %v1034_v42 }
  0x23   : > { %945 = vmatprep.subr.bf16.mxu1 %v1070_v18 }
  0x24   : > { %458 = vmatpush1.bf16.msra.mxu0 %v1028_v16 }
  0x25   : > { %953 = vmatprep.subr.bf16.mxu0 %v1070_v18 }
  0x26   : > { %946 = vmatpush3.bf16.msra.mxu1 %v1035_v43 }
  0x27   : > { %476 = vmatmul.mubr.bf16.vlgmr.msra.gmra.mrb[0].mxu0 %v265_v17  ;;  %947 = vmatprep.subr.bf16.mxu1 %v1070_v18 }
  0x28   : > { %955 = vmatprep.mubr.msk.bf16.mxu0 %vm1071_vm0, %v1070_v18 }
  0x2a   : > { %948 = vmatpush3.bf16.msra.mxu1 %v1036_v45 }
  0x2b   : > { %959 = vmatprep.subr.bf16.mxu1 %v1070_v18 }
  0x2d   : > { %950 = vmatmul.mubr.bf16.vlgmr.msra.gmra.mrb[0].mxu1 %v265_v17 }
  0x2e   : > { %961 = vmatprep.mubr.msk.bf16.mxu1 %vm1071_vm0, %v1070_v18 }
  0xfa   : > { %v477_v26 = vpop.f32.mrb[0].mxu0 }
  0xfb   : > { %v479_v27 = vpop.f32.mrb[1].mxu0  ;;  %v478_v31 = vadd.f32 %v477_v26, %v303_v25 }
  0xfc   : > { %v480_v28 = vadd.f32 %v479_v27, %v307_v24  ;;  %v481_v29 = vpop.f32.mrb[2].mxu0 }
  0xfd   : > { %v482_v30 = vpop.f32.mrb[3].mxu0  ;;  %v524_v34 = vpack.c.bf16 %v478_v31, %v478_v31 }
  0xfe   : > { %v525_v32 = vpack.c.bf16 %v480_v28, %v480_v28 }
 0x100   : > { %v539_v33 = vsel %vm534_vm1, %v525_v32, 0  ;;  %647 = vrot.lane.b32.xlu0 %v525_v32, %s1072_s9  ;;  %v518_v1 = vpop.f32.mrb[0].mxu1 }
 0x101   : > { %954 = vmatpush3.bf16.xpose.msra.mxu0 %v539_v33  ;;  %v951_v2 = vpop.f32.mrb[1].mxu1  ;;  %v519_v6 = vadd.f32 %v518_v1, %v311_v3 }
 0x102   : > { %965 = vmatprep.subr.bf16.mxu0 %v1070_v18  ;;  %v521_v4 = vpop.f32.mrb[2].mxu1 }
 0x103   : > { %v952_v5 = vpop.f32.mrb[3].mxu1  ;;  %v526_v7 = vpack.c.bf16 %v519_v6, %v519_v6 }
 0x104   : > { %644 = vrot.lane.b32.xlu0 %v524_v34, %s1072_s9 }
 0x105   : > { %v601_v8 = vsel %vm599_vm3, %v526_v7, 0 }
 0x106   : > { %960 = vmatpush3.bf16.msra.mxu1 %v601_v8 }
 0x107   : > { %971 = vmatprep.subr.bf16.mxu1 %v1070_v18 }
 0x108   : > { %956 = vmatmul.mubr.msk.bf16.vlgmr.msra.gmra.mrb[4].mxu0 %vm534_vm1, %v524_v34 }
 0x109   : > { %967 = vmatprep.mubr.msk.bf16.mxu0 %vm1071_vm0, %v1070_v18 }
 0x172   : > { %v648_v40 = vpop.permute.xlu0 %647 }
 0x173   : > { %v653_v41 = vsel %vm534_vm1, %v648_v40, 0 }
 0x174   : > { %966 = vmatpush3.bf16.xpose.msra.mxu0 %v653_v41 }
 0x176   : > { %v645_v44 = vpop.permute.xlu0 %644 }
 0x17b   : > { %968 = vmatmul.mubr.msk.bf16.vlgmr.msra.gmra.mrb[8].mxu0 %vm534_vm1, %v645_v44 }
 0x1db   : > { %v575_v46 = vpop.f32.mrb[4].mxu0 }
 0x1dc   : > { %v581_v48 = vmul.f32 0.125, %v575_v46  ;;  %v957_v49 = vpop.f32.mrb[5].mxu0 }
 0x1dd   : > { %v578_v50 = vpop.f32.mrb[6].mxu0 }
 0x1de   : > { %v958_v51 = vpop.f32.mrb[7].mxu0  ;;  %v582_v52 = vadd.f32 %v909_v47, %v581_v48 }
 0x1e0   : > { %v584_v53 = vsel %vm583_vm2, %v582_v52, -inf }
 0x1e1   : > { %585 = vmax.xlane.f32.xlu1 %v584_v53 }
 0x24e   : > { %v689_v54 = vpop.f32.mrb[8].mxu0 }
 0x24f   : > { %v695_v55 = vmul.f32 0.125, %v689_v54  ;;  %v969_v56 = vpop.f32.mrb[9].mxu0 }
 0x250   : > { %v692_v57 = vpop.f32.mrb[10].mxu0 }
 0x251   : > { %v970_v58 = vpop.f32.mrb[11].mxu0  ;;  %v696_v59 = vadd.f32 %v909_v47, %v695_v55 }
 0x253   : > { %v697_v60 = vsel %vm583_vm2, %v696_v59, -inf }
 0x254   : > { %698 = vmax.xlane.f32.xlu1 %v697_v60 }
 0x26e   : > { %v586_v61 = vpop.xlane.xlu1 %585 }
 0x26f   : > { %v587_v62 = vsub.f32 %v582_v52, %v586_v61 }
 0x271   : > { %v588_v63 = vmul.f32 1.442695, %v587_v62 }
 0x273   : > { %1037 = vpow2.f32 %v588_v63 }
 0x27d   : > { %v1038_v9 = vpop.eup %1037 }
 0x27e   : > { %v590_v10 = vsel %vm583_vm2, %v1038_v9, 0.0 }
 0x27f   : > { %591 = vadd.xlane.f32.xlu0 %v590_v10 }
 0x2e1   : > { %v699_v11 = vpop.xlane.xlu1 %698 }
 0x2e2   : > { %v700_v12 = vsub.f32 %v696_v59, %v699_v11 }
 0x2e4   : > { %v701_v13 = vmul.f32 1.442695, %v700_v12 }
 0x2e6   : > { %1039 = vpow2.f32 %v701_v13 }
 0x2f0   : > { %v1040_v14 = vpop.eup %1039 }
 0x2f1   : > { %v703_v15 = vsel %vm583_vm2, %v1040_v14, 0.0 }
 0x2f2   : > { %704 = vadd.xlane.f32.xlu1 %v703_v15 }
 0x303   : > { %710 = vrot.lane.b32.xlu1 %v526_v7, %s1072_s9 }
 0x30c   : > { %v592_v16 = vpop.xlane.xlu0 %591 }
 0x30d   : > { %1041 = vrcp.f32 %v592_v16 }
 0x317   : > { %v1042_v17 = vpop.eup %1041 }
 0x318   : > { %v594_v19 = vmul.f32 %v1042_v17, %v1038_v9 }
 0x31a   : > { %v595_v20 = vpack.c.bf16 %v594_v19, %v594_v19 }
 0x31c   : > { %962 = vmatmul.mubr.msk.bf16.vlgmr.msra.gmra.mrb[4].mxu1 %vm583_vm2, %v595_v20 }
 0x31d   : > { %973 = vmatprep.mubr.msk.bf16.mxu1 %vm1071_vm0, %v1070_v18 }
 0x37f   : > { %v705_v21 = vpop.xlane.xlu1 %704 }
 0x380   : > { %1043 = vrcp.f32 %v705_v21 }
 0x383   : > { %v711_v22 = vpop.permute.xlu1 %710 }
 0x384   : > { %v716_v23 = vsel %vm599_vm3, %v711_v22, 0 }
 0x385   : > { %972 = vmatpush3.bf16.msra.mxu1 %v716_v23 }
 0x38a   : > { %v1044_v24 = vpop.eup %1043 }
 0x38b   : > { %v707_v25 = vmul.f32 %v1044_v24, %v1040_v14 }
 0x38d   : > { %v708_v26 = vpack.c.bf16 %v707_v25, %v707_v25 }
 0x38f   : > { %974 = vmatmul.mubr.msk.bf16.vlgmr.msra.gmra.mrb[8].mxu1 %vm583_vm2, %v708_v26 }
 0x3ef   : > { %v637_v27 = vpop.f32.mrb[4].mxu1 }
 0x3f0   : > { %v963_v28 = vpop.f32.mrb[5].mxu1 }
 0x3f1   : > { %v640_v29 = vpop.f32.mrb[6].mxu1 }
 0x3f2   : > { %v964_v30 = vpop.f32.mrb[7].mxu1 }
 0x462   : > { %v752_v31 = vpop.f32.mrb[8].mxu1 }
 0x463   : > { %759 = vrot.lane.b32.xlu1 %v752_v31, %s1072_s9  ;;  %v975_v18 = vpop.f32.mrb[9].mxu1 }
 0x464   : > { %v755_v32 = vpop.f32.mrb[10].mxu1 }
 0x465   : > { %v976_v33 = vpop.f32.mrb[11].mxu1 }
 0x4d5   : > { %v760_v34 = vpop.permute.xlu1 %759 }
 0x4d6   : > { %v762_v35 = vsel %vm534_vm1, %v637_v27, %v760_v34 }
 0x4d7   : > { %v763_v36 = vpack.c.bf16 %v762_v35, %v762_v35 }
 0x4d9   : > { %764 = vst [vmem:[%s263_s11] sm:$0xf] %v763_v36 }
 0x4da PF: > { %s14_s17 = sadd.s32 1, %s1067_s17   ;;  %s1275_s15 = smov %s1063_s16 }
 0x4db   : > { %p11_p5 = scmp.ge.s32.totalorder %s14_s17, 4   ;;  %s1276_s16 = smov %s1278_s18 }
 0x4dd   :  { %13 = sbr.rel (!%p11_p5) target bundleno = 2 (0x2), region = 75 }

// kernel: bert_encoder_forward.10
= control target key start
LH: loop header
LB: loop body
LE: loop exit
PB: predicated region body
PF: predicated region fallthrough
CT: control target
= control target key end

     0   :  { %v1041_v1 = vmov 0   ;;  %s1342_s1 = inlined_call_operand.vmem [shape: bf16[128,512], index: 1, kind: input, shape index: {}]   ;;  %s1343_s0 = inlined_call_operand.vmem [shape: bf16[16,128], index: 0, kind: input, shape index: {}]   ;;  %s1344_s3 = inlined_call_operand.vmem [shape: bf16[512,128], index: 3, kind: input, shape index: {}]   ;;  %s1345_s2 = inlined_call_operand.vmem [shape: f32[1,512], index: 2, kind: input, shape index: {}]   ;;  %s1346_s4 = inlined_call_operand.vmem [shape: f32[3,128], index: 4, kind: input, shape index: {}]   ;;  %s1347_s5 = inlined_call_operand.vmem [shape: bf16[16,128], index: 5, kind: output, shape index: {}]  }
   0x1   :  { %v939_v0 = vld [vmem:[%s1342_s1 + $0x4] ss:$16 sps:$4 sm:$0xff]   ;;  %281 = vmatprep.mubr.bf16.mxu0 %v1041_v1  ;;  %324 = vmatprep.mubr.bf16.mxu1 %v1041_v1  ;;  %v941_v2 = vld [vmem:[%s1342_s1 + $0xc] ss:$16 sps:$4 sm:$0xff]   ;;  %v943_v3 = vld [vmem:[%s1342_s1] ss:$16 sps:$4 sm:$0xff]  }
   0x2   :  { %249 = vmatprep.subr.bf16.mxu0 %v939_v0  ;;  %v944_v4 = vld [vmem:[%s1342_s1 + $0x8] ss:$16 sps:$4 sm:$0xff]   ;;  %292 = vmatprep.subr.bf16.mxu1 %v941_v2  ;;  %v945_v5 = vld [vmem:[%s1342_s1 + $0x24] ss:$16 sps:$4 sm:$0xff]   ;;  %v947_v6 = vld [vmem:[%s1342_s1 + $0x2c] ss:$16 sps:$4 sm:$0xff]   ;;  %v63_v2 = vlaneseq }
   0x3   :  { %250 = vmatpush1.bf16.msra.mxu0 %v943_v3  ;;  %293 = vmatpush1.bf16.msra.mxu1 %v944_v4  ;;  %v949_v7 = vld [vmem:[%s1342_s1 + $0x20] ss:$16 sps:$4 sm:$0xff]   ;;  %v950_v8 = vld [vmem:[%s1342_s1 + $0x28] ss:$16 sps:$4 sm:$0xff]   ;;  %v951_v9 = vld [vmem:[%s1342_s1 + $0x44] ss:$16 sps:$4 sm:$0xff]  }
   0x4   :  { %251 = vmatprep.subr.bf16.mxu0 %v945_v5  ;;  %294 = vmatprep.subr.bf16.mxu1 %v947_v6  ;;  %v953_v10 = vld [vmem:[%s1342_s1 + $0x4c] ss:$16 sps:$4 sm:$0xff]   ;;  %v955_v11 = vld [vmem:[%s1342_s1 + $0x40] ss:$16 sps:$4 sm:$0xff]   ;;  %v956_v12 = vld [vmem:[%s1342_s1 + $0x48] ss:$16 sps:$4 sm:$0xff]  }
   0x5   :  { %v957_v13 = vld [vmem:[%s1342_s1 + $0x64] ss:$16 sps:$4 sm:$0xff]   ;;  %v959_v14 = vld [vmem:[%s1342_s1 + $0x6c] ss:$16 sps:$4 sm:$0xff]   ;;  %v961_v15 = vld [vmem:[%s1342_s1 + $0x60] ss:$16 sps:$4 sm:$0xff]  }
   0x6   :  { %v962_v16 = vld [vmem:[%s1342_s1 + $0x68] ss:$16 sps:$4 sm:$0xff]   ;;  %v963_v17 = vld [vmem:[%s1342_s1 + $0x84] ss:$16 sps:$4 sm:$0xff]   ;;  %v965_v18 = vld [vmem:[%s1342_s1 + $0x8c] ss:$16 sps:$4 sm:$0xff]  }
   0x7   :  { %252 = vmatpush1.bf16.msra.mxu0 %v949_v7  ;;  %295 = vmatpush1.bf16.msra.mxu1 %v950_v8  ;;  %v967_v19 = vld [vmem:[%s1342_s1 + $0x80] ss:$16 sps:$4 sm:$0xff]   ;;  %v968_v20 = vld [vmem:[%s1342_s1 + $0x88] ss:$16 sps:$4 sm:$0xff]   ;;  %v969_v21 = vld [vmem:[%s1342_s1 + $0xa4] ss:$16 sps:$4 sm:$0xff]  }
   0x8   :  { %253 = vmatprep.subr.bf16.mxu0 %v951_v9  ;;  %296 = vmatprep.subr.bf16.mxu1 %v953_v10  ;;  %v971_v22 = vld [vmem:[%s1342_s1 + $0xac] ss:$16 sps:$4 sm:$0xff]   ;;  %v973_v23 = vld [vmem:[%s1342_s1 + $0xa0] ss:$16 sps:$4 sm:$0xff]   ;;  %v974_v24 = vld [vmem:[%s1342_s1 + $0xa8] ss:$16 sps:$4 sm:$0xff]  }
   0x9   :  { %v975_v25 = vld [vmem:[%s1342_s1 + $0xc4] ss:$16 sps:$4 sm:$0xff]   ;;  %v977_v26 = vld [vmem:[%s1342_s1 + $0xcc] ss:$16 sps:$4 sm:$0xff]   ;;  %v979_v27 = vld [vmem:[%s1342_s1 + $0xc0] ss:$16 sps:$4 sm:$0xff]  }
   0xa   :  { %v980_v28 = vld [vmem:[%s1342_s1 + $0xc8] ss:$16 sps:$4 sm:$0xff]   ;;  %v981_v29 = vld [vmem:[%s1342_s1 + $0xe4] ss:$16 sps:$4 sm:$0xff]   ;;  %v983_v30 = vld [vmem:[%s1342_s1 + $0xec] ss:$16 sps:$4 sm:$0xff]  }
   0xb   :  { %254 = vmatpush1.bf16.msra.mxu0 %v955_v11  ;;  %297 = vmatpush1.bf16.msra.mxu1 %v956_v12  ;;  %v985_v31 = vld [vmem:[%s1342_s1 + $0xe0] ss:$16 sps:$4 sm:$0xff]   ;;  %v986_v32 = vld [vmem:[%s1342_s1 + $0xe8] ss:$16 sps:$4 sm:$0xff]   ;;  %v1271_v3 = vshrl.u32 %v63_v2, 7 }
   0xc   :  { %255 = vmatprep.subr.bf16.mxu0 %v957_v13  ;;  %298 = vmatprep.subr.bf16.mxu1 %v959_v14  ;;  %v1171_v33 = vld [vmem:[%s1343_s0] sm:$0xff]   ;;  %v992_v38 = vld [vmem:[%s1344_s3 + $0x48] sm:$0xff]   ;;  %v996_v42 = vld [vmem:[%s1344_s3 + $0x50] sm:$0xff]  }
   0xd   :  { %v988_v34 = vld [vmem:[%s1344_s3 + $0x40] sm:$0xff]   ;;  %v993_v39 = vld [vmem:[%s1344_s3 + $0xc8] sm:$0xff]   ;;  %v997_v43 = vld [vmem:[%s1344_s3 + $0xd0] sm:$0xff]   ;;  %v65_v4 = vsub.s32 0, %v1271_v3  ;;  %v73_v5 = vsub.s32 2, %v1271_v3  ;;  %v69_v7 = vsub.s32 1, %v1271_v3 }
   0xe   :  { %v989_v35 = vld [vmem:[%s1344_s3 + $0xc0] sm:$0xff]   ;;  %v994_v40 = vld [vmem:[%s1344_s3 + $0x8] sm:$0xff]   ;;  %v998_v44 = vld [vmem:[%s1344_s3 + $0x10] sm:$0xff]   ;;  %v77_v8 = vsub.s32 3, %v1271_v3 }
   0xf   :  { %256 = vmatpush1.bf16.msra.mxu0 %v961_v15  ;;  %299 = vmatpush1.bf16.msra.mxu1 %v962_v16  ;;  %v990_v36 = vld [vmem:[%s1344_s3] sm:$0xff]   ;;  %v995_v41 = vld [vmem:[%s1344_s3 + $0x88] sm:$0xff]   ;;  %v999_v45 = vld [vmem:[%s1344_s3 + $0x90] sm:$0xff]  }
  0x10   :  { %257 = vmatprep.subr.bf16.mxu0 %v963_v17  ;;  %300 = vmatprep.subr.bf16.mxu1 %v965_v18  ;;  %v991_v37 = vld [vmem:[%s1344_s3 + $0x80] sm:$0xff]   ;;  %v1000_v46 = vld [vmem:[%s1344_s3 + $0x58] sm:$0xff]   ;;  %v1008_v54 = vld [vmem:[%s1344_s3 + $0x68] sm:$0xff]  }
  0x11   :  { %v1001_v47 = vld [vmem:[%s1344_s3 + $0xd8] sm:$0xff]   ;;  %v1004_v50 = vld [vmem:[%s1344_s3 + $0x60] sm:$0xff]   ;;  %v1009_v55 = vld [vmem:[%s1344_s3 + $0xe8] sm:$0xff]  }
  0x12   :  { %v1002_v48 = vld [vmem:[%s1344_s3 + $0x18] sm:$0xff]   ;;  %v1005_v51 = vld [vmem:[%s1344_s3 + $0xe0] sm:$0xff]   ;;  %v1010_v56 = vld [vmem:[%s1344_s3 + $0x28] sm:$0xff]  }
  0x13   :  { %258 = vmatpush1.bf16.msra.mxu0 %v967_v19  ;;  %301 = vmatpush1.bf16.msra.mxu1 %v968_v20  ;;  %v1003_v49 = vld [vmem:[%s1344_s3 + $0x98] sm:$0xff]   ;;  %v1006_v52 = vld [vmem:[%s1344_s3 + $0x20] sm:$0xff]   ;;  %v1011_v57 = vld [vmem:[%s1344_s3 + $0xa8] sm:$0xff]  }
  0x14   :  { %259 = vmatprep.subr.bf16.mxu0 %v969_v21  ;;  %302 = vmatprep.subr.bf16.mxu1 %v971_v22  ;;  %v1007_v53 = vld [vmem:[%s1344_s3 + $0xa0] sm:$0xff]   ;;  %v1012_v58 = vld [vmem:[%s1344_s3 + $0x70] sm:$0xff]   ;;  %v1016_v62 = vld [vmem:[%s1344_s3 + $0x78] sm:$0xff]  }
  0x15   :  { %v1013_v59 = vld [vmem:[%s1344_s3 + $0xf0] sm:$0xff]   ;;  %v1017_v63 = vld [vmem:[%s1344_s3 + $0xf8] sm:$0xff]   ;;  %v61_v6 = vld [vmem:[%s1345_s2] sm:$0xf] }
  0x16   :  { %v1014_v60 = vld [vmem:[%s1344_s3 + $0x30] sm:$0xff]   ;;  %v1018_v0 = vld [vmem:[%s1344_s3 + $0x38] sm:$0xff]   ;;  %v66_v9 = vrot.slane %v61_v6, %v65_v4  ;;  %v74_v10 = vrot.slane %v61_v6, %v73_v5  ;;  %v70_v11 = vrot.slane %v61_v6, %v69_v7  ;;  %v78_v12 = vrot.slane %v61_v6, %v77_v8 }
  0x17   :  { %260 = vmatpush1.bf16.msra.mxu0 %v973_v23  ;;  %303 = vmatpush1.bf16.msra.mxu1 %v974_v24  ;;  %v1015_v61 = vld [vmem:[%s1344_s3 + $0xb0] sm:$0xff]   ;;  %v1019_v1 = vld [vmem:[%s1344_s3 + $0xb8] sm:$0xff]  }
  0x18   :  { %261 = vmatprep.subr.bf16.mxu0 %v975_v25  ;;  %304 = vmatprep.subr.bf16.mxu1 %v977_v26 }
  0x1b   :  { %262 = vmatpush1.bf16.msra.mxu0 %v979_v27  ;;  %305 = vmatpush1.bf16.msra.mxu1 %v980_v28 }
  0x1c   :  { %263 = vmatprep.subr.bf16.mxu0 %v981_v29  ;;  %306 = vmatprep.subr.bf16.mxu1 %v983_v30 }
  0x1f   :  { %264 = vmatpush1.bf16.msra.mxu0 %v985_v31  ;;  %307 = vmatpush1.bf16.msra.mxu1 %v986_v32 }
  0x20   :  { %894 = vmatprep.subr.bf16.mxu0 %v988_v34  ;;  %916 = vmatprep.subr.bf16.mxu1 %v989_v35 }
  0x22   :  { %282 = vmatmul.mubr.bf16.vlgmr.msra.gmra.mrb[0].mxu0 %v1171_v33  ;;  %325 = vmatmul.mubr.bf16.vlgmr.msra.gmra.mrb[0].mxu1 %v1171_v33 }
  0x23   :  { %895 = vmatpush3.bf16.msra.mxu0 %v990_v36  ;;  %917 = vmatpush3.bf16.msra.mxu1 %v991_v37 }
  0x24   :  { %896 = vmatprep.subr.bf16.mxu0 %v992_v38  ;;  %918 = vmatprep.subr.bf16.mxu1 %v993_v39 }
  0x27   :  { %897 = vmatpush3.bf16.msra.mxu0 %v994_v40  ;;  %919 = vmatpush3.bf16.msra.mxu1 %v995_v41 }
  0x28   :  { %898 = vmatprep.subr.bf16.mxu0 %v996_v42  ;;  %920 = vmatprep.subr.bf16.mxu1 %v997_v43 }
  0x2b   :  { %899 = vmatpush3.bf16.msra.mxu0 %v998_v44  ;;  %921 = vmatpush3.bf16.msra.mxu1 %v999_v45 }
  0x2c   :  { %900 = vmatprep.subr.bf16.mxu0 %v1000_v46  ;;  %922 = vmatprep.subr.bf16.mxu1 %v1001_v47 }
  0x2f   :  { %901 = vmatpush3.bf16.msra.mxu0 %v1002_v48  ;;  %923 = vmatpush3.bf16.msra.mxu1 %v1003_v49 }
  0x30   :  { %902 = vmatprep.subr.bf16.mxu0 %v1004_v50  ;;  %924 = vmatprep.subr.bf16.mxu1 %v1005_v51 }
  0x33   :  { %903 = vmatpush3.bf16.msra.mxu0 %v1006_v52  ;;  %925 = vmatpush3.bf16.msra.mxu1 %v1007_v53 }
  0x34   :  { %904 = vmatprep.subr.bf16.mxu0 %v1008_v54  ;;  %926 = vmatprep.subr.bf16.mxu1 %v1009_v55 }
  0x37   :  { %905 = vmatpush3.bf16.msra.mxu0 %v1010_v56  ;;  %927 = vmatpush3.bf16.msra.mxu1 %v1011_v57 }
  0x38   :  { %906 = vmatprep.subr.bf16.mxu0 %v1012_v58  ;;  %928 = vmatprep.subr.bf16.mxu1 %v1013_v59 }
  0x3b   :  { %907 = vmatpush3.bf16.msra.mxu0 %v1014_v60  ;;  %929 = vmatpush3.bf16.msra.mxu1 %v1015_v61 }
  0x3c   :  { %908 = vmatprep.subr.bf16.mxu0 %v1016_v62  ;;  %930 = vmatprep.subr.bf16.mxu1 %v1017_v63 }
  0x3f   :  { %909 = vmatpush3.bf16.msra.mxu0 %v1018_v0  ;;  %931 = vmatpush3.bf16.msra.mxu1 %v1019_v1 }
  0xf5   :  { %v283_v13 = vpop.f32.mrb[0].mxu0  ;;  %v326_v14 = vpop.f32.mrb[0].mxu1 }
  0xf6   :  { %v1286_v15 = vadd.f32 %v283_v13, %v66_v9  ;;  %v1288_v16 = vadd.f32 %v326_v14, %v74_v10  ;;  %v285_v17 = vpop.f32.mrb[1].mxu0  ;;  %v328_v18 = vpop.f32.mrb[1].mxu1 }
  0xf7   :  { %v1290_v19 = vadd.f32 %v285_v17, %v70_v11  ;;  %v1292_v20 = vadd.f32 %v328_v18, %v78_v12  ;;  %v287_v21 = vpop.f32.mrb[2].mxu0  ;;  %v330_v22 = vpop.f32.mrb[2].mxu1 }
  0xf8   :  { %v343_v23 = vmul.f32 0.044715, %v1286_v15  ;;  %v345_v24 = vmul.f32 0.044715, %v1288_v16  ;;  %v288_v25 = vadd.f32 %v287_v21, %v66_v9  ;;  %v331_v26 = vadd.f32 %v330_v22, %v74_v10  ;;  %v289_v27 = vpop.f32.mrb[3].mxu0  ;;  %v332_v28 = vpop.f32.mrb[3].mxu1 }
  0xf9   :  { %v344_v29 = vmul.f32 0.044715, %v1290_v19  ;;  %v346_v30 = vmul.f32 0.044715, %v1292_v20  ;;  %v1298_v31 = vadd.f32 %v289_v27, %v70_v11  ;;  %v1300_v32 = vadd.f32 %v332_v28, %v78_v12 }
  0xfa   :  { %v351_v34 = vmul.f32 %v343_v23, %v1286_v15  ;;  %v353_v35 = vmul.f32 %v345_v24, %v1288_v16  ;;  %v347_v36 = vmul.f32 0.044715, %v288_v25  ;;  %v349_v37 = vmul.f32 0.044715, %v331_v26 }
  0xfb   :  { %v352_v38 = vmul.f32 %v344_v29, %v1290_v19  ;;  %v354_v39 = vmul.f32 %v346_v30, %v1292_v20  ;;  %v348_v40 = vmul.f32 0.044715, %v1298_v31  ;;  %v350_v41 = vmul.f32 0.044715, %v1300_v32 }
  0xfc   :  { %v359_v42 = vmul.f32 %v351_v34, %v1286_v15  ;;  %v361_v43 = vmul.f32 %v353_v35, %v1288_v16  ;;  %v355_v44 = vmul.f32 %v347_v36, %v288_v25  ;;  %v357_v45 = vmul.f32 %v349_v37, %v331_v26 }
  0xfd   :  { %v360_v46 = vmul.f32 %v352_v38, %v1290_v19  ;;  %v362_v47 = vmul.f32 %v354_v39, %v1292_v20  ;;  %v356_v48 = vmul.f32 %v348_v40, %v1298_v31  ;;  %v358_v49 = vmul.f32 %v350_v41, %v1300_v32 }
  0xfe   :  { %v367_v50 = vadd.f32 %v359_v42, %v1286_v15  ;;  %v369_v51 = vadd.f32 %v361_v43, %v1288_v16  ;;  %v363_v52 = vmul.f32 %v355_v44, %v288_v25  ;;  %v365_v53 = vmul.f32 %v357_v45, %v331_v26 }
  0xff   :  { %v364_v54 = vmul.f32 %v356_v48, %v1298_v31  ;;  %v366_v55 = vmul.f32 %v358_v49, %v1300_v32  ;;  %v368_v60 = vadd.f32 %v360_v46, %v1290_v19  ;;  %v370_v0 = vadd.f32 %v362_v47, %v1292_v20 }
 0x100   :  { %v375_v56 = vmul.f32 0.7978846, %v367_v50  ;;  %v377_v57 = vmul.f32 0.7978846, %v369_v51  ;;  %v371_v58 = vadd.f32 %v363_v52, %v288_v25  ;;  %v373_v59 = vadd.f32 %v365_v53, %v331_v26 }
 0x101   :  { %v372_v61 = vadd.f32 %v364_v54, %v1298_v31  ;;  %v376_v1 = vmul.f32 0.7978846, %v368_v60  ;;  %v374_v6 = vadd.f32 %v366_v55, %v1300_v32  ;;  %v378_v8 = vmul.f32 0.7978846, %v370_v0 }
 0x102   :  { %1021 = vtanh.f32 %v375_v56  ;;  %v379_v62 = vmul.f32 0.7978846, %v371_v58  ;;  %v381_v63 = vmul.f32 0.7978846, %v373_v59  ;;  %v335_v18 = vmul.f32 0.5, %v1286_v15 }
 0x103   :  { %1023 = vtanh.f32 %v377_v57  ;;  %v380_v2 = vmul.f32 0.7978846, %v372_v61  ;;  %v382_v9 = vmul.f32 0.7978846, %v374_v6  ;;  %v339_v21 = vmul.f32 0.5, %v288_v25 }
 0x104   :  { %1025 = vtanh.f32 %v379_v62  ;;  %v337_v24 = vmul.f32 0.5, %v1288_v16  ;;  %v341_v27 = vmul.f32 0.5, %v331_v26  ;;  %v336_v30 = vmul.f32 0.5, %v1290_v19 }
 0x105   :  { %1027 = vtanh.f32 %v381_v63  ;;  %v340_v38 = vmul.f32 0.5, %v1298_v31  ;;  %v338_v25 = vmul.f32 0.5, %v1292_v20  ;;  %v342_v42 = vmul.f32 0.5, %v1300_v32  ;;  %v758_v20 = vld [vmem:[%s1346_s4] sm:$0x7] }
 0x106   :  { %1029 = vtanh.f32 %v376_v1  ;;  %v764_v58 = vrot.slane %v758_v20, %v65_v4  ;;  %v767_v62 = vunpack.c.l.bf16 %v1171_v33  ;;  %v768_v6 = vunpack.c.h.bf16 %v1171_v33 }
 0x107   :  { %1031 = vtanh.f32 %v380_v2 }
 0x108   :  { %1033 = vtanh.f32 %v378_v8 }
 0x109   :  { %1035 = vtanh.f32 %v382_v9 }
 0x10c   :  { %v1022_v10 = vpop.eup %1021 }
 0x10d   :  { %v1024_v11 = vpop.eup %1023  ;;  %v391_v12 = vadd.f32 1.0, %v1022_v10 }
 0x10e   :  { %v1026_v13 = vpop.eup %1025  ;;  %v393_v14 = vadd.f32 1.0, %v1024_v11 }
 0x10f   :  { %v1028_v17 = vpop.eup %1027  ;;  %v395_v22 = vadd.f32 1.0, %v1026_v13  ;;  %v399_v35 = vmul.f32 %v391_v12, %v335_v18 }
 0x110   :  { %v1030_v23 = vpop.eup %1029  ;;  %v397_v28 = vadd.f32 1.0, %v1028_v17  ;;  %v401_v40 = vmul.f32 %v393_v14, %v337_v24 }
 0x111   :  { %v1032_v29 = vpop.eup %1031  ;;  %v392_v34 = vadd.f32 1.0, %v1030_v23  ;;  %v403_v36 = vmul.f32 %v395_v22, %v339_v21 }
 0x112   :  { %v1034_v37 = vpop.eup %1033  ;;  %v396_v39 = vadd.f32 1.0, %v1032_v29  ;;  %v405_v41 = vmul.f32 %v397_v28, %v341_v27  ;;  %v797_v27 = vrot.slane %v758_v20, %v69_v7  ;;  %v803_v29 = vrot.slane %v758_v20, %v73_v5 }
 0x113   :  { %v1036_v15 = vpop.eup %1035  ;;  %v394_v16 = vadd.f32 1.0, %v1034_v37  ;;  %v409_v26 = vpack.c.bf16 %v403_v36, %v399_v35  ;;  %v400_v43 = vmul.f32 %v392_v34, %v336_v30 }
 0x114   :  { %v404_v44 = vmul.f32 %v396_v39, %v340_v38  ;;  %v398_v45 = vadd.f32 1.0, %v1036_v15  ;;  %v411_v19 = vpack.c.bf16 %v405_v41, %v401_v40 }
 0x115   :  { %v402_v47 = vmul.f32 %v394_v16, %v338_v25 }
 0x116   :  { %v410_v46 = vpack.c.bf16 %v404_v44, %v400_v43  ;;  %v406_v48 = vmul.f32 %v398_v45, %v342_v42 }
 0x118   :  { %701 = vmatprep.mubr.bf16.mxu0 %v410_v46  ;;  %v412_v49 = vpack.c.bf16 %v406_v48, %v402_v47 }
 0x119   :  { %702 = vmatmul.mubr.bf16.vlgmr.msra.gmra.mrb[4].mxu0 %v409_v26 }
 0x11a   :  { %742 = vmatprep.mubr.bf16.mxu1 %v412_v49 }
 0x11b   :  { %743 = vmatmul.mubr.bf16.vlgmr.msra.gmra.mrb[4].mxu1 %v411_v19 }
 0x1ec   :  { %v910_v31 = vpop.f32.mrb[4].mxu0 }
 0x1ed   :  { %v911_v32 = vpop.f32.mrb[5].mxu0 }
 0x1ee   :  { %v932_v50 = vpop.f32.mrb[4].mxu1  ;;  %v912_v51 = vadd.f32 %v911_v32, %v910_v31  ;;  %v913_v52 = vpop.f32.mrb[6].mxu0 }
 0x1ef   :  { %v933_v53 = vpop.f32.mrb[5].mxu1  ;;  %v914_v54 = vpop.f32.mrb[7].mxu0 }
 0x1f0   :  { %v934_v55 = vadd.f32 %v933_v53, %v932_v50  ;;  %v935_v56 = vpop.f32.mrb[6].mxu1  ;;  %v915_v57 = vadd.f32 %v914_v54, %v913_v52 }
 0x1f1   :  { %v936_v59 = vpop.f32.mrb[7].mxu1 }
 0x1f2   :  { %v745_v60 = vadd.f32 %v934_v55, %v912_v51  ;;  %v937_v61 = vadd.f32 %v936_v59, %v935_v56 }
 0x1f4   :  { %v748_v63 = vadd.f32 %v937_v61, %v915_v57  ;;  %v765_v0 = vadd.f32 %v764_v58, %v745_v60 }
 0x1f6   :  { %v769_v1 = vadd.f32 %v767_v62, %v765_v0  ;;  %v766_v2 = vadd.f32 %v764_v58, %v748_v63 }
 0x1f8   :  { %771 = vadd.xlane.f32.xlu0 %v769_v1  ;;  %v770_v8 = vadd.f32 %v768_v6, %v766_v2 }
 0x1fc   :  { %773 = vadd.xlane.f32.xlu0 %v770_v8 }
 0x285   :  { %v772_v9 = vpop.xlane.xlu0 %771 }
 0x286   :  { %v776_v10 = vmul.f32 0.0078125, %v772_v9 }
 0x288   :  { %v778_v11 = vsub.f32 %v769_v1, %v776_v10 }
 0x289   :  { %v774_v12 = vpop.xlane.xlu0 %773 }
 0x28a   :  { %v777_v13 = vmul.f32 0.0078125, %v774_v12  ;;  %v780_v4 = vmul.f32 %v778_v11, %v778_v11 }
 0x28c   :  { %v779_v14 = vsub.f32 %v770_v8, %v777_v13  ;;  %782 = vadd.xlane.f32.xlu1 %v780_v4 }
 0x28e   :  { %v781_v17 = vmul.f32 %v779_v14, %v779_v14 }
 0x290   :  { %784 = vadd.xlane.f32.xlu1 %v781_v17 }
 0x319   :  { %v783_v18 = vpop.xlane.xlu1 %782 }
 0x31a   :  { %v786_v21 = vmul.f32 0.0078125, %v783_v18 }
 0x31c   :  { %v788_v22 = vadd.f32 1e-12, %v786_v21 }
 0x31d   :  { %v785_v23 = vpop.xlane.xlu1 %784 }
 0x31e   :  { %1037 = vrsqrt.f32 %v788_v22  ;;  %v787_v24 = vmul.f32 0.0078125, %v785_v23 }
 0x320   :  { %v789_v33 = vadd.f32 1e-12, %v787_v24 }
 0x322   :  { %1039 = vrsqrt.f32 %v789_v33 }
 0x328   :  { %v1038_v28 = vpop.eup %1037 }
 0x329   :  { %v792_v30 = vmul.f32 %v1038_v28, %v778_v11 }
 0x32b   :  { %v798_v34 = vmul.f32 %v797_v27, %v792_v30 }
 0x32c   :  { %v1040_v35 = vpop.eup %1039 }
 0x32d   :  { %v804_v36 = vadd.f32 %v803_v29, %v798_v34  ;;  %v793_v37 = vmul.f32 %v1040_v35, %v779_v14 }
 0x32f   :  { %v799_v38 = vmul.f32 %v797_v27, %v793_v37 }
 0x331   :  { %v805_v39 = vadd.f32 %v803_v29, %v799_v38 }
 0x333   :  { %v892_v40 = vpack.c.bf16 %v805_v39, %v804_v36 }
 0x335   :  { %893 = vst [vmem:[%s1347_s5] sm:$0xff] %v892_v40  }

</bundles_post_ra>
